<compile_context>
chip_gen: v6e
topology: v6e:2x2x1
jax: 0.10.0
libtpu: 0.0.40
codegen_flags: <defaults>
</compile_context>

<pallas_src>
import functools
import math

import jax
import jax.numpy as jnp
from jax.experimental import pallas as pl
from jax.experimental.pallas import tpu as pltpu


def _layernorm(y, gamma, beta, eps=1e-5):
    mu = jnp.mean(y, axis=-1, keepdims=True)
    var = jnp.mean((y - mu) ** 2, axis=-1, keepdims=True)
    return (y - mu) * jax.lax.rsqrt(var + eps) * gamma + beta


def transformer_block_kernel(
    xf_ref,                       # (1, S, D)  bf16 full sequence (for K/V)
    xq_ref,                       # (1, TQ, D) f32  query-row tile (residual)
    wq_ref, bq_ref,               # (D, D) bf16, (1, D) f32
    wk_ref, bk_ref,
    wv_ref, bv_ref,
    wo_ref, bo_ref,
    g1_ref, be1_ref,              # (1, D) f32
    w1_ref, b1_ref,               # (D, dff) bf16, (1, dff) f32
    w2_ref, b2_ref,               # (dff, D) bf16, (1, D) f32
    g2_ref, be2_ref,              # (1, D) f32
    out_ref,                      # (1, TQ, D) f32
    k_cache, v_cache,             # (S, D) bf16 VMEM scratch
    ctx_ref,                      # (TQ, D) bf16 VMEM scratch
    *, n_heads, d_k,
):
    bf16 = jnp.bfloat16

    # --- K/V projections: computed once per batch element (first q-tile) and
    #     cached in VMEM scratch across the "arbitrary" q-tile axis. ---------
    @pl.when(pl.program_id(1) == 0)
    def _():
        xf = xf_ref[0]                                            # (S, D) bf16
        k_cache[...] = (jnp.dot(xf, wk_ref[...],
                                preferred_element_type=jnp.float32)
                        + bk_ref[...]).astype(bf16)
        v_cache[...] = (jnp.dot(xf, wv_ref[...],
                                preferred_element_type=jnp.float32)
                        + bv_ref[...]).astype(bf16)

    xq_f32 = xq_ref[0]                                            # (TQ, D) f32
    xq = xq_f32.astype(bf16)
    scale = 1.0 / math.sqrt(d_k)

    # --- full-width Q projection; 1/sqrt(d_k) folded into Q (TQ x D). -------
    q = ((jnp.dot(xq, wq_ref[...], preferred_element_type=jnp.float32)
          + bq_ref[...]) * scale).astype(bf16)                    # (TQ, D)

    # --- per-head attention; contexts written into a (TQ, D) bf16 scratch at
    #     static lane offsets so the output projection is one full-width dot.
    # TODO(synk): for very large n_heads, switch to a bounded-unroll fori_loop.
    for h in range(n_heads):
        lo = h * d_k
        hi = lo + d_k
        q_h = q[:, lo:hi]                                         # (TQ, dk)
        k_h = k_cache[:, lo:hi]                                   # (S, dk)
        v_h = v_cache[:, lo:hi]                                   # (S, dk)

        # scores = q_h @ k_h^T with the transpose folded into the MXU operand.
        s = jax.lax.dot_general(
            q_h, k_h, dimension_numbers=(((1,), (1,)), ((), ())),
            preferred_element_type=jnp.float32)                   # (TQ, S) f32

        # softmax (f32); normalisation via approx reciprocal on the EUP.
        s = s - jnp.max(s, axis=-1, keepdims=True)
        p = jnp.exp(s)
        p = p * pl.reciprocal(jnp.sum(p, axis=-1, keepdims=True), approx=True)

        ctx_ref[:, lo:hi] = jnp.dot(
            p.astype(bf16), v_h,
            preferred_element_type=jnp.float32).astype(bf16)      # (TQ, dk)

    # --- output projection (full-width) + residual + LayerNorm 1 ------------
    attn = jnp.dot(ctx_ref[...], wo_ref[...],
                   preferred_element_type=jnp.float32) + bo_ref[...]
    x1 = _layernorm(xq_f32 + attn, g1_ref[...], be1_ref[...])

    # --- feed-forward (bf16 matmuls, f32 accumulate / elementwise) ----------
    h1 = jnp.dot(x1.astype(bf16), w1_ref[...],
                 preferred_element_type=jnp.float32) + b1_ref[...]
    h1 = jnp.maximum(h1, 0.0)                                     # ReLU
    ff = jnp.dot(h1.astype(bf16), w2_ref[...],
                 preferred_element_type=jnp.float32) + b2_ref[...]

    # --- residual + LayerNorm 2 ----------------------------------------------
    out_ref[0] = _layernorm(x1 + ff, g2_ref[...], be2_ref[...])


def _q_tile_target():
    """Generation-aware q-tile target: 128 on v5-class (128-wide MXU), else 256."""
    kind = jax.devices()[0].device_kind.lower()
    return 128 if "v5" in kind else 256


def _pick_tq(seq_len, target):
    """Largest q-tile <= target that divides seq_len (multiple of 8)."""
    if seq_len <= target:
        return seq_len
    for tq in range(target, 0, -8):
        if seq_len % tq == 0:
            return tq
    return seq_len


def _vmem_limit_bytes(est_bytes):
    # Size from actual block/scratch bytes plus margin; clamp so the limit is
    # valid on every generation (v7x has only 64 MiB of physical VMEM).
    return int(min(max(est_bytes + (8 << 20), 32 << 20), 56 << 20))


def transformer_block(x, params, *, n_heads):
    B, S, D = x.shape
    d_ff = params["w1"].shape[1]
    d_k = D // n_heads
    TQ = _pick_tq(S, _q_tile_target())
    n_q_tiles = S // TQ

    bf16 = jnp.bfloat16
    x_bf16 = x.astype(bf16)                     # full-seq slab (K/V input)
    wq = params["wq"].astype(bf16)
    wk = params["wk"].astype(bf16)
    wv = params["wv"].astype(bf16)
    wo = params["wo"].astype(bf16)
    w1 = params["w1"].astype(bf16)
    w2 = params["w2"].astype(bf16)

    kernel = functools.partial(transformer_block_kernel,
                               n_heads=n_heads, d_k=d_k)

    def const(shape):
        # Full-array block with a grid-invariant index map (weights / biases).
        return pl.BlockSpec(shape, lambda b, qi: (0,) * len(shape))

    in_specs = [
        pl.BlockSpec((1, S, D), lambda b, qi: (b, 0, 0)),    # x bf16 (full seq)
        pl.BlockSpec((1, TQ, D), lambda b, qi: (b, qi, 0)),  # x f32 (q tile)
        const((D, D)), const((1, D)),        # wq, bq
        const((D, D)), const((1, D)),        # wk, bk
        const((D, D)), const((1, D)),        # wv, bv
        const((D, D)), const((1, D)),        # wo, bo
        const((1, D)), const((1, D)),        # gamma1, beta1
        const((D, d_ff)), const((1, d_ff)),  # w1, b1
        const((d_ff, D)), const((1, D)),     # w2, b2
        const((1, D)), const((1, D)),        # gamma2, beta2
    ]

    # Rough per-step VMEM estimate (x2 for double-buffered inputs/outputs).
    est = (
        2 * (S * D * 2)                       # full-seq x slab (bf16)
        + 2 * (TQ * D * 4) * 2                # q-tile input + output (f32)
        + 2 * ((4 * D * D + 2 * D * d_ff) * 2)   # matmul weights (bf16)
        + 2 * ((10 * D + d_ff) * 4)           # biases / LayerNorm params (f32)
        + (2 * S * D + TQ * D) * 2            # K/V/context VMEM scratch (bf16)
    )

    return pl.pallas_call(
        kernel,
        out_shape=jax.ShapeDtypeStruct((B, S, D), jnp.float32),
        grid_spec=pltpu.PrefetchScalarGridSpec(
            num_scalar_prefetch=0,
            grid=(B, n_q_tiles),
            in_specs=in_specs,
            out_specs=pl.BlockSpec((1, TQ, D), lambda b, qi: (b, qi, 0)),
            scratch_shapes=[
                pltpu.VMEM((S, D), bf16),    # K cache
                pltpu.VMEM((S, D), bf16),    # V cache
                pltpu.VMEM((TQ, D), bf16),   # per-head contexts
            ],
        ),
        compiler_params=pltpu.CompilerParams(
            dimension_semantics=("parallel", "arbitrary"),
            vmem_limit_bytes=_vmem_limit_bytes(est)),
    )(
        x_bf16, x,
        wq, params["bq"], wk, params["bk"], wv, params["bv"],
        wo, params["bo"],
        params["g1"], params["be1"],
        w1, params["b1"], w2, params["b2"],
        params["g2"], params["be2"],
    )


def _reference(x, params, n_heads):
    """Pure-JAX reference matching the PyTorch forward (eval mode, f32)."""
    B, S, D = x.shape
    d_k = D // n_heads

    q = x @ params["wq"] + params["bq"][0]
    k = x @ params["wk"] + params["bk"][0]
    v = x @ params["wv"] + params["bv"][0]

    def split(t):  # (B,S,D) -> (B,H,S,dk)
        return t.reshape(B, S, n_heads, d_k).transpose(0, 2, 1, 3)

    qh, kh, vh = split(q), split(k), split(v)
    scores = jnp.einsum("bhqd,bhkd->bhqk", qh, kh) / math.sqrt(d_k)
    attn = jax.nn.softmax(scores, axis=-1)
    ctx = jnp.einsum("bhqk,bhkd->bhqd", attn, vh)
    ctx = ctx.transpose(0, 2, 1, 3).reshape(B, S, D)
    attn_out = ctx @ params["wo"] + params["bo"][0]

    def ln(y, g, b):
        mu = jnp.mean(y, axis=-1, keepdims=True)
        var = jnp.mean((y - mu) ** 2, axis=-1, keepdims=True)
        return (y - mu) / jnp.sqrt(var + 1e-5) * g[0] + b[0]

    x1 = ln(x + attn_out, params["g1"], params["be1"])
    ff = jnp.maximum(x1 @ params["w1"] + params["b1"][0], 0.0) @ params["w2"] \
        + params["b2"][0]
    return ln(x1 + ff, params["g2"], params["be2"])


def make_params(key, d_model, d_ff):
    ks = jax.random.split(key, 8)
    s = 0.02
    return {
        "wq": jax.random.normal(ks[0], (d_model, d_model), jnp.float32) * s,
        "wk": jax.random.normal(ks[1], (d_model, d_model), jnp.float32) * s,
        "wv": jax.random.normal(ks[2], (d_model, d_model), jnp.float32) * s,
        "wo": jax.random.normal(ks[3], (d_model, d_model), jnp.float32) * s,
        "bq": jax.random.normal(ks[4], (1, d_model), jnp.float32) * s,
        "bk": jax.random.normal(ks[5], (1, d_model), jnp.float32) * s,
        "bv": jnp.zeros((1, d_model), jnp.float32),
        "bo": jnp.zeros((1, d_model), jnp.float32),
        "g1": jnp.ones((1, d_model), jnp.float32),
        "be1": jnp.zeros((1, d_model), jnp.float32),
        "w1": jax.random.normal(ks[6], (d_model, d_ff), jnp.float32) * s,
        "b1": jnp.zeros((1, d_ff), jnp.float32),
        "w2": jax.random.normal(ks[7], (d_ff, d_model), jnp.float32) * s,
        "b2": jnp.zeros((1, d_model), jnp.float32),
        "g2": jnp.ones((1, d_model), jnp.float32),
        "be2": jnp.zeros((1, d_model), jnp.float32),
    }


if __name__ == "__main__":
    B, S, d_model, n_heads, d_ff = 2, 8, 32, 4, 64

    key = jax.random.PRNGKey(0)
    kx, kp = jax.random.split(key)
    x = jax.random.normal(kx, (B, S, d_model), jnp.float32)
    params = make_params(kp, d_model, d_ff)

    out = transformer_block(x, params, n_heads=n_heads)
    out = jax.block_until_ready(out)

    ref = _reference(x, params, n_heads)
    assert out.shape == (B, S, d_model)
    # bf16 matmuls (f32 accumulation) -> looser tolerance than pure f32.
    max_err = float(jnp.max(jnp.abs(out - ref)))
    assert jnp.allclose(out, ref, atol=2e-2, rtol=2e-2), f"mismatch: {max_err}"

    print("KERNEL_OK")
</pallas_src>

<mosaic_0001>
module attributes {stable_mosaic.version = 11 : i64} {
  func.func @transformer_block_kernel(%arg0: i32, %arg1: i32, %arg2: memref<1x8x32xbf16, #tpu.memory_space<vmem>>, %arg3: memref<1x8x32xf32, #tpu.memory_space<vmem>>, %arg4: memref<32x32xbf16, #tpu.memory_space<vmem>>, %arg5: memref<1x32xf32, #tpu.memory_space<vmem>>, %arg6: memref<32x32xbf16, #tpu.memory_space<vmem>>, %arg7: memref<1x32xf32, #tpu.memory_space<vmem>>, %arg8: memref<32x32xbf16, #tpu.memory_space<vmem>>, %arg9: memref<1x32xf32, #tpu.memory_space<vmem>>, %arg10: memref<32x32xbf16, #tpu.memory_space<vmem>>, %arg11: memref<1x32xf32, #tpu.memory_space<vmem>>, %arg12: memref<1x32xf32, #tpu.memory_space<vmem>>, %arg13: memref<1x32xf32, #tpu.memory_space<vmem>>, %arg14: memref<32x64xbf16, #tpu.memory_space<vmem>>, %arg15: memref<1x64xf32, #tpu.memory_space<vmem>>, %arg16: memref<64x32xbf16, #tpu.memory_space<vmem>>, %arg17: memref<1x32xf32, #tpu.memory_space<vmem>>, %arg18: memref<1x32xf32, #tpu.memory_space<vmem>>, %arg19: memref<1x32xf32, #tpu.memory_space<vmem>>, %arg20: memref<1x8x32xf32, #tpu.memory_space<vmem>>, %arg21: memref<8x32xbf16, #tpu.memory_space<vmem>>, %arg22: memref<8x32xbf16, #tpu.memory_space<vmem>>, %arg23: memref<8x32xbf16, #tpu.memory_space<vmem>>) attributes {dimension_semantics = [#tpu.dimension_semantics<parallel>, #tpu.dimension_semantics<arbitrary>], iteration_bounds = array<i64: 2, 1>, scalar_prefetch = 0 : i64, scratch_operands = 3 : i64, tpu.core_type = #tpu.core_type<tc>, window_params = [{transform_indices = @transform_0, window_bounds = array<i64: 1, 8, 32>}, {transform_indices = @transform_1, window_bounds = array<i64: 1, 8, 32>}, {pipeline_mode = #tpu.pipeline_mode<synchronous>, transform_indices = @transform_2, window_bounds = array<i64: 32, 32>}, {pipeline_mode = #tpu.pipeline_mode<synchronous>, transform_indices = @transform_3, window_bounds = array<i64: 1, 32>}, {pipeline_mode = #tpu.pipeline_mode<synchronous>, transform_indices = @transform_4, window_bounds = array<i64: 32, 32>}, {pipeline_mode = #tpu.pipeline_mode<synchronous>, transform_indices = @transform_5, window_bounds = array<i64: 1, 32>}, {pipeline_mode = #tpu.pipeline_mode<synchronous>, transform_indices = @transform_6, window_bounds = array<i64: 32, 32>}, {pipeline_mode = #tpu.pipeline_mode<synchronous>, transform_indices = @transform_7, window_bounds = array<i64: 1, 32>}, {pipeline_mode = #tpu.pipeline_mode<synchronous>, transform_indices = @transform_8, window_bounds = array<i64: 32, 32>}, {pipeline_mode = #tpu.pipeline_mode<synchronous>, transform_indices = @transform_9, window_bounds = array<i64: 1, 32>}, {pipeline_mode = #tpu.pipeline_mode<synchronous>, transform_indices = @transform_10, window_bounds = array<i64: 1, 32>}, {pipeline_mode = #tpu.pipeline_mode<synchronous>, transform_indices = @transform_11, window_bounds = array<i64: 1, 32>}, {pipeline_mode = #tpu.pipeline_mode<synchronous>, transform_indices = @transform_12, window_bounds = array<i64: 32, 64>}, {pipeline_mode = #tpu.pipeline_mode<synchronous>, transform_indices = @transform_13, window_bounds = array<i64: 1, 64>}, {pipeline_mode = #tpu.pipeline_mode<synchronous>, transform_indices = @transform_14, window_bounds = array<i64: 64, 32>}, {pipeline_mode = #tpu.pipeline_mode<synchronous>, transform_indices = @transform_15, window_bounds = array<i64: 1, 32>}, {pipeline_mode = #tpu.pipeline_mode<synchronous>, transform_indices = @transform_16, window_bounds = array<i64: 1, 32>}, {pipeline_mode = #tpu.pipeline_mode<synchronous>, transform_indices = @transform_17, window_bounds = array<i64: 1, 32>}, {transform_indices = @transform_18, window_bounds = array<i64: 1, 8, 32>}]} {
    %c0_i32 = arith.constant 0 : i32
    %0 = arith.cmpi eq, %arg1, %c0_i32 : i32
    %1 = arith.extui %0 : i1 to i32
    %c0_i32_0 = arith.constant 0 : i32
    %2 = arith.cmpi ne, %1, %c0_i32_0 : i32
    scf.if %2 {
      %c0_84 = arith.constant 0 : index
      %c0_85 = arith.constant 0 : index
      %c0_86 = arith.constant 0 : index
      %159 = vector.load %arg2[%c0_84, %c0_85, %c0_86] : memref<1x8x32xbf16, #tpu.memory_space<vmem>>, vector<1x8x32xbf16>
      %160 = vector.shape_cast %159 : vector<1x8x32xbf16> to vector<8x32xbf16>
      %c0_87 = arith.constant 0 : index
      %c0_88 = arith.constant 0 : index
      %161 = vector.load %arg6[%c0_87, %c0_88] : memref<32x32xbf16, #tpu.memory_space<vmem>>, vector<32x32xbf16>
      %cst_89 = arith.constant dense<0.000000e+00> : vector<8x32xf32>
      %162 = tpu.matmul %160, %161, %cst_89 {dimension_numbers = #tpu.dot_dimension_numbers<[1], [0], [0], [1], [0, 0, 1, 1], [], []>} : vector<8x32xbf16>, vector<32x32xbf16>, vector<8x32xf32> -> vector<8x32xf32>
      %c0_90 = arith.constant 0 : index
      %c0_91 = arith.constant 0 : index
      %163 = vector.load %arg7[%c0_90, %c0_91] : memref<1x32xf32, #tpu.memory_space<vmem>>, vector<1x32xf32>
      %164 = vector.broadcast %163 : vector<1x32xf32> to vector<8x32xf32>
      %165 = arith.addf %162, %164 : vector<8x32xf32>
      %166 = arith.truncf %165 : vector<8x32xf32> to vector<8x32xbf16>
      %c0_92 = arith.constant 0 : index
      %c0_93 = arith.constant 0 : index
      %167 = vector.load %arg21[%c0_92, %c0_93] : memref<8x32xbf16, #tpu.memory_space<vmem>>, vector<8x32xbf16>
      tpu.vector_store %arg21[%c0_92, %c0_93], %166 {strides = array<i32>} : memref<8x32xbf16, #tpu.memory_space<vmem>>, vector<8x32xbf16>,
      %c0_94 = arith.constant 0 : index
      %c0_95 = arith.constant 0 : index
      %168 = vector.load %arg8[%c0_94, %c0_95] : memref<32x32xbf16, #tpu.memory_space<vmem>>, vector<32x32xbf16>
      %cst_96 = arith.constant dense<0.000000e+00> : vector<8x32xf32>
      %169 = tpu.matmul %160, %168, %cst_96 {dimension_numbers = #tpu.dot_dimension_numbers<[1], [0], [0], [1], [0, 0, 1, 1], [], []>} : vector<8x32xbf16>, vector<32x32xbf16>, vector<8x32xf32> -> vector<8x32xf32>
      %c0_97 = arith.constant 0 : index
      %c0_98 = arith.constant 0 : index
      %170 = vector.load %arg9[%c0_97, %c0_98] : memref<1x32xf32, #tpu.memory_space<vmem>>, vector<1x32xf32>
      %171 = vector.broadcast %170 : vector<1x32xf32> to vector<8x32xf32>
      %172 = arith.addf %169, %171 : vector<8x32xf32>
      %173 = arith.truncf %172 : vector<8x32xf32> to vector<8x32xbf16>
      %c0_99 = arith.constant 0 : index
      %c0_100 = arith.constant 0 : index
      %174 = vector.load %arg22[%c0_99, %c0_100] : memref<8x32xbf16, #tpu.memory_space<vmem>>, vector<8x32xbf16>
      tpu.vector_store %arg22[%c0_99, %c0_100], %173 {strides = array<i32>} : memref<8x32xbf16, #tpu.memory_space<vmem>>, vector<8x32xbf16>,
    } else {
    }
    %c0 = arith.constant 0 : index
    %c0_1 = arith.constant 0 : index
    %c0_2 = arith.constant 0 : index
    %3 = vector.load %arg3[%c0, %c0_1, %c0_2] : memref<1x8x32xf32, #tpu.memory_space<vmem>>, vector<1x8x32xf32>
    %4 = vector.shape_cast %3 : vector<1x8x32xf32> to vector<8x32xf32>
    %5 = arith.truncf %4 : vector<8x32xf32> to vector<8x32xbf16>
    %c0_3 = arith.constant 0 : index
    %c0_4 = arith.constant 0 : index
    %6 = vector.load %arg4[%c0_3, %c0_4] : memref<32x32xbf16, #tpu.memory_space<vmem>>, vector<32x32xbf16>
    %cst = arith.constant dense<0.000000e+00> : vector<8x32xf32>
    %7 = tpu.matmul %5, %6, %cst {dimension_numbers = #tpu.dot_dimension_numbers<[1], [0], [0], [1], [0, 0, 1, 1], [], []>} : vector<8x32xbf16>, vector<32x32xbf16>, vector<8x32xf32> -> vector<8x32xf32>
    %c0_5 = arith.constant 0 : index
    %c0_6 = arith.constant 0 : index
    %8 = vector.load %arg5[%c0_5, %c0_6] : memref<1x32xf32, #tpu.memory_space<vmem>>, vector<1x32xf32>
    %9 = vector.broadcast %8 : vector<1x32xf32> to vector<8x32xf32>
    %10 = arith.addf %7, %9 : vector<8x32xf32>
    %cst_7 = arith.constant 0.353553385 : f32
    %11 = vector.broadcast %cst_7 : f32 to vector<8x32xf32>
    %12 = arith.mulf %10, %11 : vector<8x32xf32>
    %13 = arith.truncf %12 : vector<8x32xf32> to vector<8x32xbf16>
    %14 = vector.extract_strided_slice %13 {offsets = [0, 0], sizes = [8, 8], strides = [1, 1]} : vector<8x32xbf16> to vector<8x8xbf16>
    %c0_8 = arith.constant 0 : index
    %c0_9 = arith.constant 0 : index
    %15 = vector.load %arg21[%c0_8, %c0_9] : memref<8x32xbf16, #tpu.memory_space<vmem>>, vector<8x8xbf16>
    %c0_10 = arith.constant 0 : index
    %c0_11 = arith.constant 0 : index
    %16 = vector.load %arg22[%c0_10, %c0_11] : memref<8x32xbf16, #tpu.memory_space<vmem>>, vector<8x8xbf16>
    %cst_12 = arith.constant dense<0.000000e+00> : vector<8x8xf32>
    %17 = tpu.matmul %14, %15, %cst_12 {dimension_numbers = #tpu.dot_dimension_numbers<[1], [1], [0], [0], [0, 0, 1, 0], [], []>} : vector<8x8xbf16>, vector<8x8xbf16>, vector<8x8xf32> -> vector<8x8xf32>
    %cst_13 = arith.constant dense<0xFF800000> : vector<8xf32>
    %18 = vector.multi_reduction <maximumf>, %17, %cst_13 [1] : vector<8x8xf32> to vector<8xf32>
    %19 = vector.shape_cast %18 : vector<8xf32> to vector<8x1xf32>
    %20 = vector.broadcast %19 : vector<8x1xf32> to vector<8x8xf32>
    %21 = arith.subf %17, %20 : vector<8x8xf32>
    %22 = math.exp %21 : vector<8x8xf32>
    %cst_14 = arith.constant dense<0.000000e+00> : vector<8xf32>
    %23 = vector.multi_reduction <add>, %22, %cst_14 [1] : vector<8x8xf32> to vector<8xf32>
    %24 = vector.shape_cast %23 : vector<8xf32> to vector<8x1xf32>
    %25 = tpu.reciprocal %24 {approx = true} : vector<8x1xf32> -> vector<8x1xf32>
    %26 = vector.broadcast %25 : vector<8x1xf32> to vector<8x8xf32>
    %27 = arith.mulf %22, %26 : vector<8x8xf32>
    %28 = arith.truncf %27 : vector<8x8xf32> to vector<8x8xbf16>
    %cst_15 = arith.constant dense<0.000000e+00> : vector<8x8xf32>
    %29 = tpu.matmul %28, %16, %cst_15 {dimension_numbers = #tpu.dot_dimension_numbers<[1], [0], [0], [1], [0, 0, 1, 1], [], []>} : vector<8x8xbf16>, vector<8x8xbf16>, vector<8x8xf32> -> vector<8x8xf32>
    %30 = arith.truncf %29 : vector<8x8xf32> to vector<8x8xbf16>
    %c0_16 = arith.constant 0 : index
    %c0_17 = arith.constant 0 : index
    %31 = vector.load %arg23[%c0_16, %c0_17] : memref<8x32xbf16, #tpu.memory_space<vmem>>, vector<8x8xbf16>
    tpu.vector_store %arg23[%c0_16, %c0_17], %30 {strides = array<i32>} : memref<8x32xbf16, #tpu.memory_space<vmem>>, vector<8x8xbf16>,
    %32 = vector.extract_strided_slice %13 {offsets = [0, 8], sizes = [8, 8], strides = [1, 1]} : vector<8x32xbf16> to vector<8x8xbf16>
    %c0_18 = arith.constant 0 : index
    %c8 = arith.constant 8 : index
    %33 = vector.load %arg21[%c0_18, %c8] : memref<8x32xbf16, #tpu.memory_space<vmem>>, vector<8x8xbf16>
    %c0_19 = arith.constant 0 : index
    %c8_20 = arith.constant 8 : index
    %34 = vector.load %arg22[%c0_19, %c8_20] : memref<8x32xbf16, #tpu.memory_space<vmem>>, vector<8x8xbf16>
    %cst_21 = arith.constant dense<0.000000e+00> : vector<8x8xf32>
    %35 = tpu.matmul %32, %33, %cst_21 {dimension_numbers = #tpu.dot_dimension_numbers<[1], [1], [0], [0], [0, 0, 1, 0], [], []>} : vector<8x8xbf16>, vector<8x8xbf16>, vector<8x8xf32> -> vector<8x8xf32>
    %cst_22 = arith.constant dense<0xFF800000> : vector<8xf32>
    %36 = vector.multi_reduction <maximumf>, %35, %cst_22 [1] : vector<8x8xf32> to vector<8xf32>
    %37 = vector.shape_cast %36 : vector<8xf32> to vector<8x1xf32>
    %38 = vector.broadcast %37 : vector<8x1xf32> to vector<8x8xf32>
    %39 = arith.subf %35, %38 : vector<8x8xf32>
    %40 = math.exp %39 : vector<8x8xf32>
    %cst_23 = arith.constant dense<0.000000e+00> : vector<8xf32>
    %41 = vector.multi_reduction <add>, %40, %cst_23 [1] : vector<8x8xf32> to vector<8xf32>
    %42 = vector.shape_cast %41 : vector<8xf32> to vector<8x1xf32>
    %43 = tpu.reciprocal %42 {approx = true} : vector<8x1xf32> -> vector<8x1xf32>
    %44 = vector.broadcast %43 : vector<8x1xf32> to vector<8x8xf32>
    %45 = arith.mulf %40, %44 : vector<8x8xf32>
    %46 = arith.truncf %45 : vector<8x8xf32> to vector<8x8xbf16>
    %cst_24 = arith.constant dense<0.000000e+00> : vector<8x8xf32>
    %47 = tpu.matmul %46, %34, %cst_24 {dimension_numbers = #tpu.dot_dimension_numbers<[1], [0], [0], [1], [0, 0, 1, 1], [], []>} : vector<8x8xbf16>, vector<8x8xbf16>, vector<8x8xf32> -> vector<8x8xf32>
    %48 = arith.truncf %47 : vector<8x8xf32> to vector<8x8xbf16>
    %c0_25 = arith.constant 0 : index
    %c8_26 = arith.constant 8 : index
    %49 = vector.load %arg23[%c0_25, %c8_26] : memref<8x32xbf16, #tpu.memory_space<vmem>>, vector<8x8xbf16>
    tpu.vector_store %arg23[%c0_25, %c8_26], %48 {strides = array<i32>} : memref<8x32xbf16, #tpu.memory_space<vmem>>, vector<8x8xbf16>,
    %50 = vector.extract_strided_slice %13 {offsets = [0, 16], sizes = [8, 8], strides = [1, 1]} : vector<8x32xbf16> to vector<8x8xbf16>
    %c0_27 = arith.constant 0 : index
    %c16 = arith.constant 16 : index
    %51 = vector.load %arg21[%c0_27, %c16] : memref<8x32xbf16, #tpu.memory_space<vmem>>, vector<8x8xbf16>
    %c0_28 = arith.constant 0 : index
    %c16_29 = arith.constant 16 : index
    %52 = vector.load %arg22[%c0_28, %c16_29] : memref<8x32xbf16, #tpu.memory_space<vmem>>, vector<8x8xbf16>
    %cst_30 = arith.constant dense<0.000000e+00> : vector<8x8xf32>
    %53 = tpu.matmul %50, %51, %cst_30 {dimension_numbers = #tpu.dot_dimension_numbers<[1], [1], [0], [0], [0, 0, 1, 0], [], []>} : vector<8x8xbf16>, vector<8x8xbf16>, vector<8x8xf32> -> vector<8x8xf32>
    %cst_31 = arith.constant dense<0xFF800000> : vector<8xf32>
    %54 = vector.multi_reduction <maximumf>, %53, %cst_31 [1] : vector<8x8xf32> to vector<8xf32>
    %55 = vector.shape_cast %54 : vector<8xf32> to vector<8x1xf32>
    %56 = vector.broadcast %55 : vector<8x1xf32> to vector<8x8xf32>
    %57 = arith.subf %53, %56 : vector<8x8xf32>
    %58 = math.exp %57 : vector<8x8xf32>
    %cst_32 = arith.constant dense<0.000000e+00> : vector<8xf32>
    %59 = vector.multi_reduction <add>, %58, %cst_32 [1] : vector<8x8xf32> to vector<8xf32>
    %60 = vector.shape_cast %59 : vector<8xf32> to vector<8x1xf32>
    %61 = tpu.reciprocal %60 {approx = true} : vector<8x1xf32> -> vector<8x1xf32>
    %62 = vector.broadcast %61 : vector<8x1xf32> to vector<8x8xf32>
    %63 = arith.mulf %58, %62 : vector<8x8xf32>
    %64 = arith.truncf %63 : vector<8x8xf32> to vector<8x8xbf16>
    %cst_33 = arith.constant dense<0.000000e+00> : vector<8x8xf32>
    %65 = tpu.matmul %64, %52, %cst_33 {dimension_numbers = #tpu.dot_dimension_numbers<[1], [0], [0], [1], [0, 0, 1, 1], [], []>} : vector<8x8xbf16>, vector<8x8xbf16>, vector<8x8xf32> -> vector<8x8xf32>
    %66 = arith.truncf %65 : vector<8x8xf32> to vector<8x8xbf16>
    %c0_34 = arith.constant 0 : index
    %c16_35 = arith.constant 16 : index
    %67 = vector.load %arg23[%c0_34, %c16_35] : memref<8x32xbf16, #tpu.memory_space<vmem>>, vector<8x8xbf16>
    tpu.vector_store %arg23[%c0_34, %c16_35], %66 {strides = array<i32>} : memref<8x32xbf16, #tpu.memory_space<vmem>>, vector<8x8xbf16>,
    %68 = vector.extract_strided_slice %13 {offsets = [0, 24], sizes = [8, 8], strides = [1, 1]} : vector<8x32xbf16> to vector<8x8xbf16>
    %c0_36 = arith.constant 0 : index
    %c24 = arith.constant 24 : index
    %69 = vector.load %arg21[%c0_36, %c24] : memref<8x32xbf16, #tpu.memory_space<vmem>>, vector<8x8xbf16>
    %c0_37 = arith.constant 0 : index
    %c24_38 = arith.constant 24 : index
    %70 = vector.load %arg22[%c0_37, %c24_38] : memref<8x32xbf16, #tpu.memory_space<vmem>>, vector<8x8xbf16>
    %cst_39 = arith.constant dense<0.000000e+00> : vector<8x8xf32>
    %71 = tpu.matmul %68, %69, %cst_39 {dimension_numbers = #tpu.dot_dimension_numbers<[1], [1], [0], [0], [0, 0, 1, 0], [], []>} : vector<8x8xbf16>, vector<8x8xbf16>, vector<8x8xf32> -> vector<8x8xf32>
    %cst_40 = arith.constant dense<0xFF800000> : vector<8xf32>
    %72 = vector.multi_reduction <maximumf>, %71, %cst_40 [1] : vector<8x8xf32> to vector<8xf32>
    %73 = vector.shape_cast %72 : vector<8xf32> to vector<8x1xf32>
    %74 = vector.broadcast %73 : vector<8x1xf32> to vector<8x8xf32>
    %75 = arith.subf %71, %74 : vector<8x8xf32>
    %76 = math.exp %75 : vector<8x8xf32>
    %cst_41 = arith.constant dense<0.000000e+00> : vector<8xf32>
    %77 = vector.multi_reduction <add>, %76, %cst_41 [1] : vector<8x8xf32> to vector<8xf32>
    %78 = vector.shape_cast %77 : vector<8xf32> to vector<8x1xf32>
    %79 = tpu.reciprocal %78 {approx = true} : vector<8x1xf32> -> vector<8x1xf32>
    %80 = vector.broadcast %79 : vector<8x1xf32> to vector<8x8xf32>
    %81 = arith.mulf %76, %80 : vector<8x8xf32>
    %82 = arith.truncf %81 : vector<8x8xf32> to vector<8x8xbf16>
    %cst_42 = arith.constant dense<0.000000e+00> : vector<8x8xf32>
    %83 = tpu.matmul %82, %70, %cst_42 {dimension_numbers = #tpu.dot_dimension_numbers<[1], [0], [0], [1], [0, 0, 1, 1], [], []>} : vector<8x8xbf16>, vector<8x8xbf16>, vector<8x8xf32> -> vector<8x8xf32>
    %84 = arith.truncf %83 : vector<8x8xf32> to vector<8x8xbf16>
    %c0_43 = arith.constant 0 : index
    %c24_44 = arith.constant 24 : index
    %85 = vector.load %arg23[%c0_43, %c24_44] : memref<8x32xbf16, #tpu.memory_space<vmem>>, vector<8x8xbf16>
    tpu.vector_store %arg23[%c0_43, %c24_44], %84 {strides = array<i32>} : memref<8x32xbf16, #tpu.memory_space<vmem>>, vector<8x8xbf16>,
    %c0_45 = arith.constant 0 : index
    %c0_46 = arith.constant 0 : index
    %86 = vector.load %arg23[%c0_45, %c0_46] : memref<8x32xbf16, #tpu.memory_space<vmem>>, vector<8x32xbf16>
    %c0_47 = arith.constant 0 : index
    %c0_48 = arith.constant 0 : index
    %87 = vector.load %arg10[%c0_47, %c0_48] : memref<32x32xbf16, #tpu.memory_space<vmem>>, vector<32x32xbf16>
    %cst_49 = arith.constant dense<0.000000e+00> : vector<8x32xf32>
    %88 = tpu.matmul %86, %87, %cst_49 {dimension_numbers = #tpu.dot_dimension_numbers<[1], [0], [0], [1], [0, 0, 1, 1], [], []>} : vector<8x32xbf16>, vector<32x32xbf16>, vector<8x32xf32> -> vector<8x32xf32>
    %c0_50 = arith.constant 0 : index
    %c0_51 = arith.constant 0 : index
    %89 = vector.load %arg11[%c0_50, %c0_51] : memref<1x32xf32, #tpu.memory_space<vmem>>, vector<1x32xf32>
    %90 = vector.broadcast %89 : vector<1x32xf32> to vector<8x32xf32>
    %91 = arith.addf %88, %90 : vector<8x32xf32>
    %92 = arith.addf %4, %91 : vector<8x32xf32>
    %c0_52 = arith.constant 0 : index
    %c0_53 = arith.constant 0 : index
    %93 = vector.load %arg12[%c0_52, %c0_53] : memref<1x32xf32, #tpu.memory_space<vmem>>, vector<1x32xf32>
    %c0_54 = arith.constant 0 : index
    %c0_55 = arith.constant 0 : index
    %94 = vector.load %arg13[%c0_54, %c0_55] : memref<1x32xf32, #tpu.memory_space<vmem>>, vector<1x32xf32>
    %cst_56 = arith.constant dense<0.000000e+00> : vector<8xf32>
    %95 = vector.multi_reduction <add>, %92, %cst_56 [1] : vector<8x32xf32> to vector<8xf32>
    %96 = vector.shape_cast %95 : vector<8xf32> to vector<8x1xf32>
    %cst_57 = arith.constant 3.200000e+01 : f32
    %97 = vector.broadcast %cst_57 : f32 to vector<8x1xf32>
    %98 = arith.divf %96, %97 : vector<8x1xf32>
    %99 = vector.broadcast %98 : vector<8x1xf32> to vector<8x32xf32>
    %100 = arith.subf %92, %99 : vector<8x32xf32>
    %101 = arith.mulf %100, %100 : vector<8x32xf32>
    %cst_58 = arith.constant dense<0.000000e+00> : vector<8xf32>
    %102 = vector.multi_reduction <add>, %101, %cst_58 [1] : vector<8x32xf32> to vector<8xf32>
    %103 = vector.shape_cast %102 : vector<8xf32> to vector<8x1xf32>
    %cst_59 = arith.constant 3.200000e+01 : f32
    %104 = vector.broadcast %cst_59 : f32 to vector<8x1xf32>
    %105 = arith.divf %103, %104 : vector<8x1xf32>
    %106 = vector.broadcast %98 : vector<8x1xf32> to vector<8x32xf32>
    %107 = arith.subf %92, %106 : vector<8x32xf32>
    %cst_60 = arith.constant 9.99999974E-6 : f32
    %108 = vector.broadcast %cst_60 : f32 to vector<8x1xf32>
    %109 = arith.addf %105, %108 : vector<8x1xf32>
    %110 = math.rsqrt %109 : vector<8x1xf32>
    %111 = vector.broadcast %110 : vector<8x1xf32> to vector<8x32xf32>
    %112 = arith.mulf %107, %111 : vector<8x32xf32>
    %113 = vector.broadcast %93 : vector<1x32xf32> to vector<8x32xf32>
    %114 = arith.mulf %112, %113 : vector<8x32xf32>
    %115 = vector.broadcast %94 : vector<1x32xf32> to vector<8x32xf32>
    %116 = arith.addf %114, %115 : vector<8x32xf32>
    %117 = arith.truncf %116 : vector<8x32xf32> to vector<8x32xbf16>
    %c0_61 = arith.constant 0 : index
    %c0_62 = arith.constant 0 : index
    %118 = vector.load %arg14[%c0_61, %c0_62] : memref<32x64xbf16, #tpu.memory_space<vmem>>, vector<32x64xbf16>
    %cst_63 = arith.constant dense<0.000000e+00> : vector<8x64xf32>
    %119 = tpu.matmul %117, %118, %cst_63 {dimension_numbers = #tpu.dot_dimension_numbers<[1], [0], [0], [1], [0, 0, 1, 1], [], []>} : vector<8x32xbf16>, vector<32x64xbf16>, vector<8x64xf32> -> vector<8x64xf32>
    %c0_64 = arith.constant 0 : index
    %c0_65 = arith.constant 0 : index
    %120 = vector.load %arg15[%c0_64, %c0_65] : memref<1x64xf32, #tpu.memory_space<vmem>>, vector<1x64xf32>
    %121 = vector.broadcast %120 : vector<1x64xf32> to vector<8x64xf32>
    %122 = arith.addf %119, %121 : vector<8x64xf32>
    %cst_66 = arith.constant 0.000000e+00 : f32
    %123 = vector.broadcast %cst_66 : f32 to vector<8x64xf32>
    %124 = arith.maximumf %122, %123 : vector<8x64xf32>
    %125 = arith.truncf %124 : vector<8x64xf32> to vector<8x64xbf16>
    %c0_67 = arith.constant 0 : index
    %c0_68 = arith.constant 0 : index
    %126 = vector.load %arg16[%c0_67, %c0_68] : memref<64x32xbf16, #tpu.memory_space<vmem>>, vector<64x32xbf16>
    %cst_69 = arith.constant dense<0.000000e+00> : vector<8x32xf32>
    %127 = tpu.matmul %125, %126, %cst_69 {dimension_numbers = #tpu.dot_dimension_numbers<[1], [0], [0], [1], [0, 0, 1, 1], [], []>} : vector<8x64xbf16>, vector<64x32xbf16>, vector<8x32xf32> -> vector<8x32xf32>
    %c0_70 = arith.constant 0 : index
    %c0_71 = arith.constant 0 : index
    %128 = vector.load %arg17[%c0_70, %c0_71] : memref<1x32xf32, #tpu.memory_space<vmem>>, vector<1x32xf32>
    %129 = vector.broadcast %128 : vector<1x32xf32> to vector<8x32xf32>
    %130 = arith.addf %127, %129 : vector<8x32xf32>
    %131 = arith.addf %116, %130 : vector<8x32xf32>
    %c0_72 = arith.constant 0 : index
    %c0_73 = arith.constant 0 : index
    %132 = vector.load %arg18[%c0_72, %c0_73] : memref<1x32xf32, #tpu.memory_space<vmem>>, vector<1x32xf32>
    %c0_74 = arith.constant 0 : index
    %c0_75 = arith.constant 0 : index
    %133 = vector.load %arg19[%c0_74, %c0_75] : memref<1x32xf32, #tpu.memory_space<vmem>>, vector<1x32xf32>
    %cst_76 = arith.constant dense<0.000000e+00> : vector<8xf32>
    %134 = vector.multi_reduction <add>, %131, %cst_76 [1] : vector<8x32xf32> to vector<8xf32>
    %135 = vector.shape_cast %134 : vector<8xf32> to vector<8x1xf32>
    %cst_77 = arith.constant 3.200000e+01 : f32
    %136 = vector.broadcast %cst_77 : f32 to vector<8x1xf32>
    %137 = arith.divf %135, %136 : vector<8x1xf32>
    %138 = vector.broadcast %137 : vector<8x1xf32> to vector<8x32xf32>
    %139 = arith.subf %131, %138 : vector<8x32xf32>
    %140 = arith.mulf %139, %139 : vector<8x32xf32>
    %cst_78 = arith.constant dense<0.000000e+00> : vector<8xf32>
    %141 = vector.multi_reduction <add>, %140, %cst_78 [1] : vector<8x32xf32> to vector<8xf32>
    %142 = vector.shape_cast %141 : vector<8xf32> to vector<8x1xf32>
    %cst_79 = arith.constant 3.200000e+01 : f32
    %143 = vector.broadcast %cst_79 : f32 to vector<8x1xf32>
    %144 = arith.divf %142, %143 : vector<8x1xf32>
    %145 = vector.broadcast %137 : vector<8x1xf32> to vector<8x32xf32>
    %146 = arith.subf %131, %145 : vector<8x32xf32>
    %cst_80 = arith.constant 9.99999974E-6 : f32
    %147 = vector.broadcast %cst_80 : f32 to vector<8x1xf32>
    %148 = arith.addf %144, %147 : vector<8x1xf32>
    %149 = math.rsqrt %148 : vector<8x1xf32>
    %150 = vector.broadcast %149 : vector<8x1xf32> to vector<8x32xf32>
    %151 = arith.mulf %146, %150 : vector<8x32xf32>
    %152 = vector.broadcast %132 : vector<1x32xf32> to vector<8x32xf32>
    %153 = arith.mulf %151, %152 : vector<8x32xf32>
    %154 = vector.broadcast %133 : vector<1x32xf32> to vector<8x32xf32>
    %155 = arith.addf %153, %154 : vector<8x32xf32>
    %c0_81 = arith.constant 0 : index
    %c0_82 = arith.constant 0 : index
    %c0_83 = arith.constant 0 : index
    %156 = vector.load %arg20[%c0_81, %c0_82, %c0_83] : memref<1x8x32xf32, #tpu.memory_space<vmem>>, vector<1x8x32xf32>
    %157 = vector.shape_cast %156 : vector<1x8x32xf32> to vector<8x32xf32>
    %158 = vector.shape_cast %155 : vector<8x32xf32> to vector<1x8x32xf32>
    tpu.vector_store %arg20[%c0_81, %c0_82, %c0_83], %158 {strides = array<i32>} : memref<1x8x32xf32, #tpu.memory_space<vmem>>, vector<1x8x32xf32>,
    return
  }
  func.func @transform_0(%arg0: i32, %arg1: i32) -> (i32, i32, i32) {
    %c0_i32 = arith.constant 0 : i32
    %c0_i32_0 = arith.constant 0 : i32
    %c0_i32_1 = arith.constant 0 : i32
    return %arg0, %c0_i32, %c0_i32_0 : i32, i32, i32
  }
  func.func @transform_1(%arg0: i32, %arg1: i32) -> (i32, i32, i32) {
    %c0_i32 = arith.constant 0 : i32
    %c0_i32_0 = arith.constant 0 : i32
    return %arg0, %arg1, %c0_i32 : i32, i32, i32
  }
  func.func @transform_2(%arg0: i32, %arg1: i32) -> (i32, i32) {
    %c0_i32 = arith.constant 0 : i32
    %c0_i32_0 = arith.constant 0 : i32
    %c0_i32_1 = arith.constant 0 : i32
    return %c0_i32, %c0_i32_0 : i32, i32
  }
  func.func @transform_3(%arg0: i32, %arg1: i32) -> (i32, i32) {
    %c0_i32 = arith.constant 0 : i32
    %c0_i32_0 = arith.constant 0 : i32
    %c0_i32_1 = arith.constant 0 : i32
    return %c0_i32, %c0_i32_0 : i32, i32
  }
  func.func @transform_4(%arg0: i32, %arg1: i32) -> (i32, i32) {
    %c0_i32 = arith.constant 0 : i32
    %c0_i32_0 = arith.constant 0 : i32
    %c0_i32_1 = arith.constant 0 : i32
    return %c0_i32, %c0_i32_0 : i32, i32
  }
  func.func @transform_5(%arg0: i32, %arg1: i32) -> (i32, i32) {
    %c0_i32 = arith.constant 0 : i32
    %c0_i32_0 = arith.constant 0 : i32
    %c0_i32_1 = arith.constant 0 : i32
    return %c0_i32, %c0_i32_0 : i32, i32
  }
  func.func @transform_6(%arg0: i32, %arg1: i32) -> (i32, i32) {
    %c0_i32 = arith.constant 0 : i32
    %c0_i32_0 = arith.constant 0 : i32
    %c0_i32_1 = arith.constant 0 : i32
    return %c0_i32, %c0_i32_0 : i32, i32
  }
  func.func @transform_7(%arg0: i32, %arg1: i32) -> (i32, i32) {
    %c0_i32 = arith.constant 0 : i32
    %c0_i32_0 = arith.constant 0 : i32
    %c0_i32_1 = arith.constant 0 : i32
    return %c0_i32, %c0_i32_0 : i32, i32
  }
  func.func @transform_8(%arg0: i32, %arg1: i32) -> (i32, i32) {
    %c0_i32 = arith.constant 0 : i32
    %c0_i32_0 = arith.constant 0 : i32
    %c0_i32_1 = arith.constant 0 : i32
    return %c0_i32, %c0_i32_0 : i32, i32
  }
  func.func @transform_9(%arg0: i32, %arg1: i32) -> (i32, i32) {
    %c0_i32 = arith.constant 0 : i32
    %c0_i32_0 = arith.constant 0 : i32
    %c0_i32_1 = arith.constant 0 : i32
    return %c0_i32, %c0_i32_0 : i32, i32
  }
  func.func @transform_10(%arg0: i32, %arg1: i32) -> (i32, i32) {
    %c0_i32 = arith.constant 0 : i32
    %c0_i32_0 = arith.constant 0 : i32
    %c0_i32_1 = arith.constant 0 : i32
    return %c0_i32, %c0_i32_0 : i32, i32
  }
  func.func @transform_11(%arg0: i32, %arg1: i32) -> (i32, i32) {
    %c0_i32 = arith.constant 0 : i32
    %c0_i32_0 = arith.constant 0 : i32
    %c0_i32_1 = arith.constant 0 : i32
    return %c0_i32, %c0_i32_0 : i32, i32
  }
  func.func @transform_12(%arg0: i32, %arg1: i32) -> (i32, i32) {
    %c0_i32 = arith.constant 0 : i32
    %c0_i32_0 = arith.constant 0 : i32
    %c0_i32_1 = arith.constant 0 : i32
    return %c0_i32, %c0_i32_0 : i32, i32
  }
  func.func @transform_13(%arg0: i32, %arg1: i32) -> (i32, i32) {
    %c0_i32 = arith.constant 0 : i32
    %c0_i32_0 = arith.constant 0 : i32
    %c0_i32_1 = arith.constant 0 : i32
    return %c0_i32, %c0_i32_0 : i32, i32
  }
  func.func @transform_14(%arg0: i32, %arg1: i32) -> (i32, i32) {
    %c0_i32 = arith.constant 0 : i32
    %c0_i32_0 = arith.constant 0 : i32
    %c0_i32_1 = arith.constant 0 : i32
    return %c0_i32, %c0_i32_0 : i32, i32
  }
  func.func @transform_15(%arg0: i32, %arg1: i32) -> (i32, i32) {
    %c0_i32 = arith.constant 0 : i32
    %c0_i32_0 = arith.constant 0 : i32
    %c0_i32_1 = arith.constant 0 : i32
    return %c0_i32, %c0_i32_0 : i32, i32
  }
  func.func @transform_16(%arg0: i32, %arg1: i32) -> (i32, i32) {
    %c0_i32 = arith.constant 0 : i32
    %c0_i32_0 = arith.constant 0 : i32
    %c0_i32_1 = arith.constant 0 : i32
    return %c0_i32, %c0_i32_0 : i32, i32
  }
  func.func @transform_17(%arg0: i32, %arg1: i32) -> (i32, i32) {
    %c0_i32 = arith.constant 0 : i32
    %c0_i32_0 = arith.constant 0 : i32
    %c0_i32_1 = arith.constant 0 : i32
    return %c0_i32, %c0_i32_0 : i32, i32
  }
  func.func @transform_18(%arg0: i32, %arg1: i32) -> (i32, i32, i32) {
    %c0_i32 = arith.constant 0 : i32
    %c0_i32_0 = arith.constant 0 : i32
    return %arg0, %arg1, %c0_i32 : i32, i32, i32
  }
}

</mosaic_0001>

<bundles_post_ra>
// kernel: tpu_custom_call.1
= control target key start
LH: loop header
LB: loop body
LE: loop exit
PB: predicated region body
PF: predicated region fallthrough
CT: control target
= control target key end

     0   :  { %s2802_s0 = inlined_call_operand.hbm [shape: bf16[2,8,32], index: 0, kind: input, shape index: {}]   ;;  %s2803_s1 = inlined_call_operand.vmem [shape: f32[2,8,32], index: 1, kind: input, shape index: {}]   ;;  %s2804_s2 = inlined_call_operand.vmem [shape: bf16[32,32], index: 2, kind: input, shape index: {}]   ;;  %s2805_s3 = inlined_call_operand.vmem [shape: f32[1,32], index: 3, kind: input, shape index: {}]   ;;  %s2806_s4 = inlined_call_operand.vmem [shape: bf16[32,32], index: 4, kind: input, shape index: {}]   ;;  %s2807_s5 = inlined_call_operand.vmem [shape: f32[1,32], index: 5, kind: input, shape index: {}]   ;;  %s2808_s6 = inlined_call_operand.hbm [shape: bf16[32,32], index: 6, kind: input, shape index: {}]   ;;  %s2809_s7 = inlined_call_operand.vmem [shape: f32[1,32], index: 7, kind: input, shape index: {}]   ;;  %s2810_s8 = inlined_call_operand.hbm [shape: bf16[32,32], index: 8, kind: input, shape index: {}]   ;;  %s2811_s9 = inlined_call_operand.vmem [shape: f32[1,32], index: 9, kind: input, shape index: {}]   ;;  %s2812_s10 = inlined_call_operand.vmem [shape: f32[1,32], index: 10, kind: input, shape index: {}]   ;;  %s2813_s11 = inlined_call_operand.vmem [shape: f32[1,32], index: 11, kind: input, shape index: {}]   ;;  %s2814_s12 = inlined_call_operand.hbm [shape: bf16[32,64], index: 12, kind: input, shape index: {}]   ;;  %s2815_s13 = inlined_call_operand.vmem [shape: f32[1,64], index: 13, kind: input, shape index: {}]   ;;  %s2816_s14 = inlined_call_operand.vmem [shape: bf16[64,32], index: 14, kind: input, shape index: {}]   ;;  %s2817_s15 = inlined_call_operand.vmem [shape: f32[1,32], index: 15, kind: input, shape index: {}]   ;;  %s2818_s16 = inlined_call_operand.vmem [shape: f32[1,32], index: 16, kind: input, shape index: {}]   ;;  %s2819_s17 = inlined_call_operand.vmem [shape: f32[1,32], index: 17, kind: input, shape index: {}]   ;;  %s2820_s18 = inlined_call_operand.hbm [shape: f32[2,8,32], index: 18, kind: output, shape index: {}]  }
   0x1   :  { %2832 = sst [smem:[#allocation22_spill]] %s2802_s0 }
   0x2   :  { %2833 = sst [smem:[#allocation23_spill]] %s2803_s1 }
   0x3   :  { %2834 = sst [smem:[#allocation24_spill]] %s2804_s2 }
   0x4   :  { %2835 = sst [smem:[#allocation25_spill]] %s2805_s3 }
   0x5   :  { %2836 = sst [smem:[#allocation26_spill]] %s2808_s6 }
   0x6   :  { %2837 = sst [smem:[#allocation27_spill]] %s2810_s8 }
   0x7   :  { %2838 = sst [smem:[#allocation28_spill]] %s2814_s12 }
   0x8   :  { %2839 = sst [smem:[#allocation29_spill]] %s2815_s13 }
   0x9   :  { %2840 = sst [smem:[#allocation30_spill]] %s2817_s15 }
   0xa   :  { %2841 = sst [smem:[#allocation31_spill]] %s2818_s16 }
   0xb   :  { %2842 = sst [smem:[#allocation32_spill]] %s2819_s17 }
   0xc   :  { %2843 = sst [smem:[#allocation33_spill]] %s2820_s18 }
   0xd   :  { %23 = vsyncpa [#allocation6], 0 }
   0xe   :  { %25 = vsyncpa [#allocation6 + $0x1], 0 }
   0xf   :  { %26 = vsyncpa [#allocation9], 0 }
  0x10   :  { %27 = vsyncpa [#allocation12], 0 }
  0x11   :  { %28 = vsyncpa [#allocation7], 0 }
  0x12   :  { %30 = vsyncpa [#allocation7 + $0x1], 0  ;;  %s2456_s27 = smov 0   ;;  %s2458_s28 = smov 0  }
  0x13   :  { %s2460_s29 = smov 0   ;;  %s2462_s30 = smov 0  }
  0x14   :  { %s2464_s0 = smov 0   ;;  %s2466_s19 = smov 0  }
  0x15 LB: > { %2844 = sst [smem:[#allocation18_spill]] %s2324_s27  ;;  %s1801_s1 = sadd.s32 4294967295, %s2344_s19   ;;  %s2344_s19 = sphi %s2466_s19, %s36_s19   ;;  %s2340_s0 = sphi %s2464_s0, %s2881_s0   ;;  %s2336_s30 = sphi %s2462_s30, %s2880_s30   ;;  %s2332_s29 = sphi %s2460_s29, %s2879_s29   ;;  %s2328_s28 = sphi %s2458_s28, %s2878_s28   ;;  %s2324_s27 = sphi %s2456_s27, %s2877_s27  }
  0x16   : > { %s1802_s20 = sadd.s32 4294967294, %s2344_s19   ;;  %p68_p0 = scmp.ne.s32.totalorder %s2328_s28, %s2324_s27 }
  0x17   : > { %p2490_p1 = scmp.eq.s32.totalorder %s1801_s1, 0  ;;  %p2494_p2 = scmp.eq.s32.totalorder %s1801_s1, 1 }
  0x18   : > { %p464_p3 = scmp.eq.s32.totalorder %s1802_s20, 1  ;;  %p1803_p5 = scmp.ge.s32.totalorder %s2344_s19, 1 }
  0x19   : > { %s2845_s21 = scalar_select %p2490_p1, 1, 0 }
  0x1a   : > { %p2500_p4 = por %p2490_p1, %p68_p0  ;;  %p2505_p6 = por %p464_p3, %p68_p0 }
  0x1b   : > { %p471_p7 = scmp.lt.s32.totalorder %s2344_s19, 3  ;;  %s2346_s25 = smov [#allocation8]  }
  0x1c   : > { %s2847_s2 = scalar_select %p2500_p4, 1, 0 }
  0x1d   : > { %s2848_s23 = scalar_select %p2505_p6, 1, 0 }
  0x1e   : > { %p2510_p8 = pnand %p1803_p5, %p471_p7  ;;  %s495_s26 = sshll.u32 %s2346_s25, 4  ;;  %s496_s26 = int_to_ptr.vmem [resolvable:$true] %s495_s26 }
  0x1f   : > { %2849 = sst [smem:[#allocation19_spill]] %s2848_s23  ;;  %s2347_s20 = smov [#allocation10]  }
  0x20   : > { %s2850_s24 = scalar_select %p2510_p8, 1, 0 }
  0x21   : > { %p2023_p9 = pneg %p2510_p8  ;;  %s511_s23 = sshll.u32 %s2347_s20, 4  ;;  %s512_s23 = int_to_ptr.vmem [resolvable:$true] %s511_s23 }
  0x22   : > { %s2348_s27 = smov [#allocation11]   ;;  %s2161_s17 = scalar_lea.vmem %s496_s26, 256 }
  0x23   : > { %p2519_p11 = pnand %p2023_p9, %p2490_p1  ;;  %s533_s18 = sshll.u32 %s2348_s27, 4  ;;  %s534_s18 = int_to_ptr.vmem [resolvable:$true] %s533_s18 }
  0x24   : > { %p2162_p13 = scmp.ne.s32.totalorder %s496_s26, %s2161_s17  ;;  %p2169_p5 = scmp.lt.s32.totalorder %s496_s26, %s496_s26 }
  0x25   : > { %p2152_p12 = pneg %p2519_p11  ;;  %p2170_p7 = scmp.lt.s32.totalorder %s2161_s17, %s2161_s17 }
  0x27   : > { %p2164_p0 = pnand %p2162_p13, %p2152_p12  ;;  %p2171_p9 = por %p2170_p7, %p2169_p5 }
  0x29   : > { %p2165_p3 = pneg %p2164_p0 }
  0x2b   : > { %p2172_p10 = pnand %p2171_p9, %p2165_p3 }
  0x2d   : > { %2175 = shalt.err (!%p2172_p10)
}
  0x2e   : > { %s2349_s25 = smov 64   ;;  %s2350_s20 = smov 4  }
  0x2f   : > { %s2852_s6 = sld [smem:[#allocation26_spill]]  ;;  %s2187_s15 = scalar_lea.vmem %s512_s23, 256 }
  0x30   : > { %p2188_p6 = scmp.ne.s32.totalorder %s512_s23, %s2187_s15  ;;  %p2195_p1 = scmp.lt.s32.totalorder %s512_s23, %s512_s23 }
  0x31   : > { %p2196_p4 = scmp.lt.s32.totalorder %s2187_s15, %s2187_s15 }
  0x32   : > { %p2190_p13 = pnand %p2188_p6, %p2152_p12 }
  0x33   : > { %p2197_p5 = por %p2196_p4, %p2195_p1 }
  0x34   : > { %p2191_p0 = pneg %p2190_p13 }
  0x35   : > { %2026 = dma.hbm_to_vmem [thread:$0]  (!%p2519_p11), %s2852_s6, 256, %s496_s26, [#allocation9], %s2349_s25, %s2349_s25, %s2350_s20  }
  0x36   : > { %p2198_p3 = pnand %p2197_p5, %p2191_p0 }
  0x38   : > { %2201 = shalt.err (!%p2198_p3)
}
  0x39   : > { %s2853_s8 = sld [smem:[#allocation27_spill]]  ;;  %s2213_s16 = scalar_lea.vmem %s534_s18, 256 }
  0x3a   : > { %p2214_p10 = scmp.ne.s32.totalorder %s534_s18, %s2213_s16  ;;  %p2221_p9 = scmp.lt.s32.totalorder %s534_s18, %s534_s18 }
  0x3b   : > { %p2222_p13 = scmp.lt.s32.totalorder %s2213_s16, %s2213_s16 }
  0x3c   : > { %p2216_p7 = pnand %p2214_p10, %p2152_p12 }
  0x3d   : > { %p2223_p8 = por %p2222_p13, %p2221_p9 }
  0x3e   : > { %p2217_p6 = pneg %p2216_p7 }
  0x3f   : > { %2029 = dma.hbm_to_vmem [thread:$0]  (!%p2519_p11), %s2853_s8, 256, %s512_s23, [#allocation9], %s2349_s25, %s2349_s25, %s2350_s20  }
  0x40   : > { %p2224_p1 = pnand %p2223_p8, %p2217_p6 }
  0x42   : > { %2227 = shalt.err (!%p2224_p1)
}
  0x43   : > { %s2854_s12 = sld [smem:[#allocation28_spill]]  ;;  %s55_s13 = sadd.s32 1, %s2332_s29 }
  0x44   : > { %s48_s23 = sadd.s32 1, %s2340_s0  ;;  %p62_p4 = scmp.ne.s32.totalorder %s2332_s29, %s2328_s28 }
  0x45   : > { %p50_p8 = scmp.ge.s32.totalorder %s48_s23, 2  ;;  %p63_p12 = scmp.eq.s32.totalorder %s2344_s19, 0 }
  0x46   : > { %p2556_p0 = por %p2494_p2, %p62_p4  ;;  %p2044_p5 = scmp.lt.s32.totalorder %s2344_s19, 2 }
  0x47   : > { %s2883_s23 = smov (%p50_p8, %s48_s23), 0  ;;  %p64_p3 = por %p63_p12, %p62_p4 }
  0x48   : > { %s2855_s1 = scalar_select %p2556_p0, 1, 0 }
  0x49   : > { %2032 = dma.hbm_to_vmem [thread:$0]  (!%p2519_p11), %s2854_s12, 256, %s534_s18, [#allocation12], %s2349_s25, %s2349_s25, %s2350_s20  }
  0x4a   : > { %2856 = sst [smem:[#allocation20_spill]] %s2855_s1  ;;  %s562_s27 = sand.u32 1, %s2332_s29  }
  0x4b   : > { %2857 = sst [smem:[#allocation21_spill]] %s2883_s23  ;;  %s52_s17 = ssub.s32 %s2340_s0, %s2883_s23 }
  0x4c   : > { %p53_p10 = scmp.eq.s32.totalorder %s52_s17, 0  ;;  %s1808_s18 = sshll.u32 %s562_s27, 2 }
  0x4d   : > { %s1809_s25 = sshll.u32 %s2340_s0, 6  ;;  %s2858_s26 = sld [smem:[#allocation22_spill]] }
  0x4e   : > { %s2568_s20 = scalar_select %p53_p10, %s2332_s29, %s55_s13  }
  0x4f   : > { %s566_s6 = scalar_lea.vmem [#allocation5], %s1808_s18  ;;  %p2575_p2 = pnand %p2044_p5, %p64_p3 }
  0x50   : > { %s573_s8 = sshll.u32 %s566_s6, 4  ;;  %s563_s1 = scalar_lea.sflag [#allocation6], %s562_s27  ;;  %s574_s8 = int_to_ptr.vmem [resolvable:$true] %s573_s8 }
  0x51   : > { %p2230_p11 = pneg %p2575_p2  ;;  %s2241_s17 = scalar_lea.vmem %s574_s8, 64 }
  0x52   : > { %p2242_p7 = scmp.ne.s32.totalorder %s574_s8, %s2241_s17  ;;  %s2351_s13 = smov [#allocation5]  }
  0x53   : > { %s571_s22 = scalar_lea.hbm %s2858_s26, %s1809_s25  ;;  %s2246_s23 = sshll.u32 %s2351_s13, 4  ;;  %s2247_s23 = int_to_ptr.vmem [resolvable:$false] %s2246_s23 }
  0x54   : > { %p2244_p6 = pnand %p2242_p7, %p2230_p11  ;;  %s2248_s25 = scalar_lea.vmem %s2247_s23, 128 }
  0x55   : > { %p2249_p13 = scmp.lt.s32.totalorder %s574_s8, %s2247_s23  ;;  %p2250_p1 = scmp.lt.s32.totalorder %s2248_s25, %s2241_s17 }
  0x56   : > { %p2245_p9 = pneg %p2244_p6 }
  0x57   : > { %p2251_p4 = por %p2250_p1, %p2249_p13 }
  0x59   : > { %p2252_p8 = pnand %p2251_p4, %p2245_p9 }
  0x5b   : > { %2255 = shalt.err (!%p2252_p8)
}
  0x5c   : > { %2036 = dma.hbm_to_vmem [thread:$0]  (!%p2575_p2), %s571_s22, 64, %s574_s8, %s563_s1  }
  0x5d   : > { %p2860_p12 = scmp.ne.s32.totalorder %s2850_s24, 0 }
  0x5e   : > { %s2586_s6 = sand.u32 (!%p2860_p12), 1, %s2328_s28   ;;  %p2861_p5 = scmp.ne.s32.totalorder (!%p2860_p12), %s2847_s2, 0 }
  0x5f   : > { %592 = sbr.rel (%p2860_p12) target bundleno = 2511 (0x9cf), region = 92  ;;  %s1811_s27 = sshll.u32 (!%p2860_p12), %s2586_s6, 2 }
  0x60   : > { %s595_s18 = scalar_lea.sflag (!%p2860_p12), [#allocation6], %s2586_s6  ;;  %s598_s16 = scalar_lea.vmem (!%p2860_p12), [#allocation5], %s1811_s27 }
  0x64   : > { %2307 = dma.done.wait (%p2861_p5), %s595_s18, 64  }
  0x65   : > { %2309 = vsyncadd (%p2861_p5), %s595_s18, 4294967232  ;;  %p2862_p3 = scmp.ne.s32.totalorder %s2845_s21, 0 }
  0x67   : > { %2311 = dma.done.wait (%p2862_p3), [#allocation9], 512  }
  0x68   : > { %2313 = vsyncadd (%p2862_p3), [#allocation9], 4294966784 }
  0x69   : > { %2315 = dma.done.wait (%p2862_p3), [#allocation12], 256  }
  0x6a   : > { %2317 = vsyncadd (%p2862_p3), [#allocation12], 4294967040  ;;  %v2352_v0 = vmov 0.0   ;;  %vm2353_vm0 = vmmov 0   ;;  %p670_p10 = scmp.lt.s32.totalorder %s2336_s30, 1  ;;  %v2110_v1 = vld [vmem:[%s2806_s4 + $0x8] sm:$0xff]  }
  0x6b   : > { %1907 = vmatprep.subr.bf16.mxu0 %v2352_v0  ;;  %1911 = vmatprep.mubr.msk.bf16.mxu0 %vm2353_vm0, %v2352_v0  ;;  %v2111_v2 = vld [vmem:[%s2806_s4] sm:$0xff]   ;;  %v682_v3 = vld [vmem:[%s598_s16] sm:$0xf]  ;;  %vm706_vm1 = vcmask 261120   ;;  %s2863_s26 = sld [smem:[#allocation24_spill]]  ;;  %v2115_v9 = vld [vmem:[#allocation8] sm:$0xff]  }
  0x6c   : > { %1915 = vmatprep.subr.bf16.mxu1 %v2352_v0  ;;  %1919 = vmatprep.mubr.msk.bf16.mxu1 %vm2353_vm0, %v2352_v0  ;;  %s671_s8 = scalar_select %p670_p10, %s2336_s30, 1  ;;  %v2114_v8 = vld [vmem:[#allocation8 + $0x8] sm:$0xff]   ;;  %vm751_vm2 = vcmask 257024   ;;  %vm891_vm3 = vcmask 64512   ;;  %vm953_vm4 = vcmask 1043456   ;;  %vm998_vm5 = vcmask 60416  }
  0x6d   : > { %1908 = vmatpush3.bf16.msra.mxu0 %v2110_v1  ;;  %s2864_s13 = sld [smem:[#allocation23_spill]]  ;;  %1916 = vmatpush3.bf16.msra.mxu1 %v2114_v8  ;;  %v1817_v10 = vld [vmem:[%s2807_s5] ss:$0 sm:$0xff]  ;;  %s2354_s21 = smov 112   ;;  %vm1126_vm6 = vcmask 126016   ;;  %vm1253_vm7 = vcmask 191616  }
  0x6e   : > { %s1816_s23 = sshll.u32 %s671_s8, 3  ;;  %1909 = vmatprep.subr.bf16.mxu0 %v2352_v0  ;;  %1917 = vmatprep.subr.bf16.mxu1 %v2352_v0  ;;  %s2865_s3 = sld [smem:[#allocation25_spill]]  ;;  %v1821_v30 = vld [vmem:[%s2809_s7] ss:$0 sm:$0xff]  ;;  %vm1380_vm8 = vcmask 257216   ;;  %vm1588_vm9 = vcmask 523264  }
  0x6f   : > { %s2355_s24 = smov 120   ;;  %s2357_s22 = smov 8  }
  0x70   : > { %s2358_s17 = smov 16   ;;  %s2866_s27 = sld [smem:[#allocation29_spill]] }
  0x71   : > { %v2112_v4 = vld [vmem:[%s2863_s26 + $0x8] sm:$0xff]   ;;  %1910 = vmatpush3.bf16.msra.mxu0 %v2111_v2  ;;  %v2113_v5 = vld [vmem:[%s2863_s26] sm:$0xff]   ;;  %1918 = vmatpush3.bf16.msra.mxu1 %v2115_v9  ;;  %s2867_s8 = sld [smem:[#allocation30_spill]]  ;;  %s1815_s12 = sshll.u32 %s2586_s6, 3 }
  0x72   : > { %1923 = vmatprep.subr.bf16.mxu0 %v2352_v0  ;;  %1931 = vmatprep.subr.bf16.mxu1 %v2352_v0  ;;  %s2871_s16 = sld [smem:[#allocation33_spill]] }
  0x73   : > { %s676_s25 = scalar_lea.vmem %s2864_s13, %s1816_s23  ;;  %s2356_s23 = smov 104  }
  0x74   : > { %v2627_v6 = vld [vmem:[%s676_s25] sm:$0xff]  ;;  %1912 = vmatmul.mubr.msk.bf16.vlgmr.msra.gmra.mxu0 %vm706_vm1, %v682_v3  ;;  %1920 = vmatmul.mubr.msk.bf16.vlgmr.msra.gmra.mxu1 %vm706_vm1, %v682_v3  ;;  %s2359_s13 = smov 24  }
  0x75   : > { %1924 = vmatpush3.bf16.msra.mxu0 %v2112_v4  ;;  %1927 = vmatprep.mubr.msk.bf16.mxu0 %vm2353_vm0, %v2352_v0  ;;  %v819_v7 = vpack.c.bf16 %v2627_v6, %v2627_v6  ;;  %v1825_v17 = vld [vmem:[%s2865_s3] ss:$0 sm:$0xff]  ;;  %s1664_s3 = scalar_lea.sflag [#allocation7], %s2586_s6 }
  0x76   : > { %1925 = vmatprep.subr.bf16.mxu0 %v2352_v0  ;;  %1933 = vmatprep.mubr.msk.bf16.mxu1 %vm2353_vm0, %v2352_v0 }
  0x79   : > { %1926 = vmatpush3.bf16.msra.mxu0 %v2113_v5 }
  0x7a   : > { %1937 = vmatprep.subr.bf16.mxu0 %v2352_v0 }
  0x7c   : > { %1928 = vmatmul.mubr.msk.bf16.vlgmr.msra.gmra.mxu0 %vm706_vm1, %v819_v7 }
  0x7d   : > { %1939 = vmatprep.mubr.msk.bf16.mxu0 %vm2353_vm0, %v2352_v0 }
 0x134   : > { %v744_v11 = vpop.f32.mrf.mxu0  ;;  %v810_v31 = vpop.f32.mrf.mxu1 }
 0x135   : > { %v745_v12 = vadd.f32 %v1817_v10, %v744_v11  ;;  %v811_v32 = vadd.f32 %v1821_v30, %v810_v31 }
 0x136   : > { %v1913_v13 = vpop.f32.mrf.mxu0  ;;  %v1921_v33 = vpop.f32.mrf.mxu1 }
 0x137   : > { %v750_v14 = vpack.c.bf16 %v745_v12, %v745_v12  ;;  %v816_v34 = vpack.c.bf16 %v811_v32, %v811_v32 }
 0x138   : > { %v747_v15 = vpop.f32.mrf.mxu0  ;;  %v813_v35 = vpop.f32.mrf.mxu1 }
 0x139   : > { %752 = vst.msk [vmem:[#allocation2] sm:$0xf] %vm751_vm2, %v750_v14  ;;  %817 = vst.msk [vmem:[#allocation3] sm:$0xf] %vm751_vm2, %v816_v34 }
 0x13a   : > { %v1914_v16 = vpop.f32.mrf.mxu0  ;;  %v1922_v36 = vpop.f32.mrf.mxu1 }
 0x13c   : > { %v881_v18 = vpop.f32.mrf.mxu0 }
 0x13d   : > { %v882_v19 = vadd.f32 %v1825_v17, %v881_v18 }
 0x13e   : > { %v1929_v20 = vpop.f32.mrf.mxu0 }
 0x13f   : > { %v887_v21 = vmul.f32 0.35355338, %v882_v19 }
 0x140   : > { %v884_v22 = vpop.f32.mrf.mxu0  ;;  %v889_v23 = vld [vmem:[#allocation2] sm:$0xf]  ;;  %v890_v37 = vld [vmem:[#allocation3] sm:$0xf] }
 0x141   : > { %v2116_v24 = vld [vmem:[#allocation2] ss:$0 sps:$4 sm:$0xff]   ;;  %v896_v25 = vsel %vm891_vm3, %v889_v23, 0  ;;  %v888_v27 = vpack.c.bf16 %v887_v21, %v887_v21  ;;  %v955_v38 = vsel %vm953_vm4, %v890_v37, 0  ;;  %v2119_v11 = vld [vmem:[#allocation3] ss:$0 sps:$4 sm:$0xff]  }
 0x142   : > { %v2117_v26 = vld [vmem:[#allocation2] ss:$0 sps:$4 sm:$0xff]   ;;  %1932 = vmatpush3.bf16.xpose.msra.mxu1 %v896_v25  ;;  %1135 = vrot.lane.b32.xlu1 %v2116_v24, %s2354_s21  ;;  %v1930_v28 = vpop.f32.mrf.mxu0  ;;  %v2121_v32 = vld [vmem:[#allocation3] ss:$0 sps:$4 sm:$0xff]  }
 0x143   : > { %1008 = vrot.lane.b32.xlu0 %v2117_v26, %s2355_s24  ;;  %1943 = vmatprep.subr.bf16.mxu1 %v2352_v0  ;;  %v2118_v29 = vld [vmem:[#allocation2] ss:$0 sps:$4 sm:$0xff]   ;;  %v2120_v28 = vld [vmem:[#allocation3] ss:$0 sps:$4 sm:$0xff]  }
 0x144   : > { %1938 = vmatpush3.bf16.msra.mxu0 %v955_v38 }
 0x145   : > { %1949 = vmatprep.subr.bf16.mxu0 %v2352_v0 }
 0x146   : > { %1130 = vrot.lane.b32.xlu1 %v888_v27, %s2354_s21 }
 0x147   : > { %1003 = vrot.lane.b32.xlu0 %v888_v27, %s2355_s24 }
 0x149   : > { %1934 = vmatmul.mubr.msk.bf16.vlgmr.msra.gmra.mxu1 %vm891_vm3, %v888_v27 }
 0x14a   : > { %1257 = vrot.lane.b32.xlu1 %v888_v27, %s2356_s23  ;;  %1945 = vmatprep.mubr.msk.bf16.mxu1 %vm2353_vm0, %v2352_v0 }
 0x14b   : > { %1262 = vrot.lane.b32.xlu0 %v2118_v29, %s2356_s23 }
 0x1b4   : > { %v1136_v41 = vpop.permute.xlu1 %1135 }
 0x1b5   : > { %v1009_v39 = vpop.permute.xlu0 %1008  ;;  %v1141_v43 = vsel %vm891_vm3, %v1136_v41, 0 }
 0x1b6   : > { %v1014_v40 = vsel %vm891_vm3, %v1009_v39, 0 }
 0x1b7   : > { %1944 = vmatpush3.bf16.xpose.msra.mxu1 %v1014_v40 }
 0x1b8   : > { %1955 = vmatprep.subr.bf16.mxu1 %v2352_v0  ;;  %v1131_v45 = vpop.permute.xlu1 %1130 }
 0x1b9   : > { %v1004_v42 = vpop.permute.xlu0 %1003 }
 0x1bc   : > { %v1258_v47 = vpop.permute.xlu1 %1257 }
 0x1bd   : > { %v1263_v44 = vpop.permute.xlu0 %1262 }
 0x1be   : > { %1946 = vmatmul.mubr.msk.bf16.vlgmr.msra.gmra.mxu1 %vm891_vm3, %v1004_v42  ;;  %v1268_v46 = vsel %vm891_vm3, %v1263_v44, 0 }
 0x1bf   : > { %1956 = vmatpush3.bf16.xpose.msra.mxu1 %v1141_v43  ;;  %1957 = vmatprep.mubr.msk.bf16.mxu1 %vm2353_vm0, %v2352_v0 }
 0x1c0   : > { %1967 = vmatprep.subr.bf16.mxu1 %v2352_v0 }
 0x1c6   : > { %1958 = vmatmul.mubr.msk.bf16.vlgmr.msra.gmra.mxu1 %vm891_vm3, %v1131_v45 }
 0x1c7   : > { %1968 = vmatpush3.bf16.xpose.msra.mxu1 %v1268_v46  ;;  %1969 = vmatprep.mubr.msk.bf16.mxu1 %vm2353_vm0, %v2352_v0 }
 0x1c8   : > { %1979 = vmatprep.subr.bf16.mxu1 %v2352_v0 }
 0x1ce   : > { %1970 = vmatmul.mubr.msk.bf16.vlgmr.msra.gmra.mxu1 %vm891_vm3, %v1258_v47 }
 0x1cf   : > { %1983 = vmatprep.mubr.msk.bf16.mxu1 %vm2353_vm0, %v2352_v0 }
 0x209   : > { %v932_v48 = vpop.f32.mrf.mxu1 }
 0x20a   : > { %v938_v49 = vsel %vm891_vm3, %v932_v48, -inf }
 0x20b   : > { %939 = vmax.xlane.f32.xlu0 %v938_v49  ;;  %v1935_v50 = vpop.f32.mrf.mxu1 }
 0x20d   : > { %v935_v51 = vpop.f32.mrf.mxu1 }
 0x20f   : > { %v1936_v52 = vpop.f32.mrf.mxu1 }
 0x27e   : > { %v1050_v53 = vpop.f32.mrf.mxu1 }
 0x27f   : > { %v1056_v54 = vsel %vm891_vm3, %v1050_v53, -inf }
 0x280   : > { %1057 = vmax.xlane.f32.xlu1 %v1056_v54  ;;  %v1947_v55 = vpop.f32.mrf.mxu1 }
 0x282   : > { %v1053_v56 = vpop.f32.mrf.mxu1 }
 0x284   : > { %v1948_v57 = vpop.f32.mrf.mxu1 }
 0x286   : > { %v1177_v58 = vpop.f32.mrf.mxu1 }
 0x287   : > { %v1183_v59 = vsel %vm891_vm3, %v1177_v58, -inf }
 0x288   : > { %1184 = vmax.xlane.f32.xlu0 %v1183_v59  ;;  %v1959_v60 = vpop.f32.mrf.mxu1 }
 0x28a   : > { %v1180_v61 = vpop.f32.mrf.mxu1 }
 0x28b   : > { %v2122_v61 = vld [vmem:[#allocation10 + $0x8] sm:$0xff]  }
 0x28c   : > { %v1960_v62 = vpop.f32.mrf.mxu1  ;;  %1980 = vmatpush3.bf16.msra.mxu1 %v2122_v61 }
 0x28d   : > { %1981 = vmatprep.subr.bf16.mxu1 %v2352_v0 }
 0x28e   : > { %v1304_v63 = vpop.f32.mrf.mxu1 }
 0x28f   : > { %v1310_v1 = vsel %vm891_vm3, %v1304_v63, -inf }
 0x290   : > { %1311 = vmax.xlane.f32.xlu0 %v1310_v1  ;;  %v1971_v2 = vpop.f32.mrf.mxu1 }
 0x292   : > { %v1307_v3 = vpop.f32.mrf.mxu1 }
 0x294   : > { %v940_v4 = vpop.xlane.xlu0 %939  ;;  %v1972_v5 = vpop.f32.mrf.mxu1 }
 0x295   : > { %v941_v7 = vsub.f32 %v932_v48, %v940_v4 }
 0x297   : > { %v942_v8 = vmul.f32 1.442695, %v941_v7 }
 0x299   : > { %2130 = vpow2.f32 %v942_v8 }
 0x2a6   : > { %v2131_v9 = vpop.eup %2130 }
 0x2a7   : > { %v944_v10 = vsel %vm891_vm3, %v2131_v9, 0.0 }
 0x2a8   : > { %945 = vadd.xlane.f32.xlu1 %v944_v10 }
 0x2b9   : > { %1071 = vrot.lane.b32.xlu1 %v2119_v11, %s2355_s24  ;;  %s2360_s24 = smov [#allocation13]  }
 0x309   : > { %v1058_v12 = vpop.xlane.xlu1 %1057 }
 0x30a   : > { %v1059_v13 = vsub.f32 %v1050_v53, %v1058_v12 }
 0x30c   : > { %v1060_v14 = vmul.f32 1.442695, %v1059_v13 }
 0x30e   : > { %2132 = vpow2.f32 %v1060_v14 }
 0x311   : > { %v1185_v15 = vpop.xlane.xlu0 %1184 }
 0x312   : > { %v1186_v16 = vsub.f32 %v1177_v58, %v1185_v15  ;;  %v1846_v15 = vld [vmem:[%s2811_s9] ss:$0 sm:$0xff] }
 0x314   : > { %v1187_v17 = vmul.f32 1.442695, %v1186_v16 }
 0x316   : > { %2134 = vpow2.f32 %v1187_v17 }
 0x319   : > { %v1312_v18 = vpop.xlane.xlu0 %1311 }
 0x31a   : > { %v1313_v19 = vsub.f32 %v1304_v63, %v1312_v18  ;;  %v2123_v63 = vld [vmem:[#allocation10] sm:$0xff]  }
 0x31b   : > { %v2133_v20 = vpop.eup %2132  ;;  %1982 = vmatpush3.bf16.msra.mxu1 %v2123_v63 }
 0x31c   : > { %v1314_v21 = vmul.f32 1.442695, %v1313_v19  ;;  %v1062_v22 = vsel %vm891_vm3, %v2133_v20, 0.0  ;;  %1995 = vmatprep.subr.bf16.mxu1 %v2352_v0 }
 0x31d   : > { %1063 = vadd.xlane.f32.xlu0 %v1062_v22 }
 0x31e   : > { %2136 = vpow2.f32 %v1314_v21 }
 0x323   : > { %v2135_v23 = vpop.eup %2134 }
 0x324   : > { %v1189_v24 = vsel %vm891_vm3, %v2135_v23, 0.0 }
 0x325   : > { %1190 = vadd.xlane.f32.xlu1 %v1189_v24 }
 0x32b   : > { %v2137_v25 = vpop.eup %2136 }
 0x32c   : > { %v1316_v26 = vsel %vm891_vm3, %v2137_v25, 0.0 }
 0x32d   : > { %1317 = vadd.xlane.f32.xlu0 %v1316_v26 }
 0x331   : > { %v946_v27 = vpop.xlane.xlu1 %945 }
 0x332   : > { %2138 = vrcp.f32 %v946_v27 }
 0x335   : > { %v1072_v31 = vpop.permute.xlu1 %1071 }
 0x336   : > { %1325 = vrot.lane.b32.xlu1 %v2120_v28, %s2356_s23  ;;  %v1077_v34 = vsel %vm953_vm4, %v1072_v31, 0  ;;  %v2124_v28 = vld [vmem:[#allocation11 + $0x8] sm:$0xff]   ;;  %s2869_s23 = sld [smem:[#allocation31_spill]] }
 0x33f   : > { %v2139_v29 = vpop.eup %2138 }
 0x340   : > { %v948_v30 = vmul.f32 %v2139_v29, %v2131_v9  ;;  %v2125_v29 = vld [vmem:[#allocation11] sm:$0xff]  }
 0x342   : > { %v949_v33 = vpack.c.bf16 %v948_v30, %v948_v30  ;;  %v2127_v30 = vld [vmem:[%s2816_s14 + $0x10] sm:$0xff]  }
 0x343   : > { %1198 = vrot.lane.b32.xlu0 %v2121_v32, %s2354_s21 }
 0x344   : > { %1940 = vmatmul.mubr.msk.bf16.vlgmr.msra.gmra.mxu0 %vm891_vm3, %v949_v33 }
 0x345   : > { %1950 = vmatpush3.bf16.msra.mxu0 %v1077_v34  ;;  %1951 = vmatprep.mubr.msk.bf16.mxu0 %vm2353_vm0, %v2352_v0 }
 0x346   : > { %1961 = vmatprep.subr.bf16.mxu0 %v2352_v0 }
 0x3a6   : > { %v1064_v35 = vpop.xlane.xlu0 %1063 }
 0x3a7   : > { %2140 = vrcp.f32 %v1064_v35  ;;  %v1850_v35 = vld [vmem:[%s2812_s10] ss:$0 sm:$0xff] }
 0x3ae   : > { %v1191_v36 = vpop.xlane.xlu1 %1190 }
 0x3af   : > { %2142 = vrcp.f32 %v1191_v36 }
 0x3b2   : > { %v1326_v45 = vpop.permute.xlu1 %1325 }
 0x3b3   : > { %v1331_v47 = vsel %vm953_vm4, %v1326_v45, 0 }
 0x3b4   : > { %v2141_v37 = vpop.eup %2140 }
 0x3b5   : > { %v1066_v38 = vmul.f32 %v2141_v37, %v2133_v20  ;;  %v1851_v37 = vld [vmem:[%s2813_s11] ss:$0 sm:$0xff] }
 0x3b6   : > { %v1318_v39 = vpop.xlane.xlu0 %1317 }
 0x3b7   : > { %2144 = vrcp.f32 %v1318_v39  ;;  %v1067_v40 = vpack.c.bf16 %v1066_v38, %v1066_v38 }
 0x3b9   : > { %1952 = vmatmul.mubr.msk.bf16.vlgmr.msra.gmra.mxu0 %vm891_vm3, %v1067_v40 }
 0x3ba   : > { %v1199_v41 = vpop.permute.xlu0 %1198  ;;  %1963 = vmatprep.mubr.msk.bf16.mxu0 %vm2353_vm0, %v2352_v0 }
 0x3bb   : > { %v1204_v42 = vsel %vm953_vm4, %v1199_v41, 0  ;;  %v2128_v41 = vld [vmem:[%s2816_s14 + $0x8] sm:$0xff]  }
 0x3bc   : > { %v2143_v43 = vpop.eup %2142  ;;  %1962 = vmatpush3.bf16.msra.mxu0 %v1204_v42  ;;  %v2129_v42 = vld [vmem:[%s2816_s14] sm:$0xff]  }
 0x3bd   : > { %1973 = vmatprep.subr.bf16.mxu0 %v2352_v0  ;;  %v1193_v44 = vmul.f32 %v2143_v43, %v2135_v23  ;;  %v1852_v43 = vld [vmem:[%s2866_s27] ss:$0 sm:$0xff] }
 0x3bf   : > { %v1194_v46 = vpack.c.bf16 %v1193_v44, %v1193_v44 }
 0x3c1   : > { %1964 = vmatmul.mubr.msk.bf16.vlgmr.msra.gmra.mxu0 %vm891_vm3, %v1194_v46 }
 0x3c2   : > { %1974 = vmatpush3.bf16.msra.mxu0 %v1331_v47  ;;  %1975 = vmatprep.mubr.msk.bf16.mxu0 %vm2353_vm0, %v2352_v0 }
 0x3c3   : > { %1987 = vmatprep.subr.bf16.mxu0 %v2352_v0 }
 0x3c4   : > { %v2145_v48 = vpop.eup %2144 }
 0x3c5   : > { %v1320_v49 = vmul.f32 %v2145_v48, %v2137_v25 }
 0x3c7   : > { %v1321_v50 = vpack.c.bf16 %v1320_v49, %v1320_v49 }
 0x3c9   : > { %1976 = vmatmul.mubr.msk.bf16.vlgmr.msra.gmra.mxu0 %vm891_vm3, %v1321_v50 }
 0x3ca   : > { %1991 = vmatprep.mubr.msk.bf16.mxu0 %vm2353_vm0, %v2352_v0  ;;  %1988 = vmatpush3.bf16.msra.mxu0 %v2124_v28 }
 0x3cb   : > { %1989 = vmatprep.subr.bf16.mxu0 %v2352_v0 }
 0x3ce   : > { %1990 = vmatpush3.bf16.msra.mxu0 %v2125_v29 }
 0x404   : > { %v991_v51 = vpop.f32.mrf.mxu0 }
 0x405   : > { %v997_v52 = vpack.c.bf16 %v991_v51, %v991_v51 }
 0x406   : > { %v1941_v53 = vpop.f32.mrf.mxu0 }
 0x407   : > { %999 = vst.msk [vmem:[#allocation4] sm:$0xf] %vm998_vm5, %v997_v52 }
 0x408   : > { %v994_v54 = vpop.f32.mrf.mxu0 }
 0x40a   : > { %v1942_v55 = vpop.f32.mrf.mxu0 }
 0x479   : > { %v1113_v56 = vpop.f32.mrf.mxu0 }
 0x47a   : > { %v1868_v57 = vpack.c.bf16 %v1113_v56, %v1113_v56 }
 0x47b   : > { %v1953_v58 = vpop.f32.mrf.mxu0 }
 0x47c   : > { %1123 = vrot.lane.b32.xlu1 %v1868_v57, %s2357_s22  ;;  %s2870_s22 = sld [smem:[#allocation32_spill]] }
 0x47d   : > { %v1116_v59 = vpop.f32.mrf.mxu0 }
 0x47f   : > { %v1954_v60 = vpop.f32.mrf.mxu0 }
 0x481   : > { %v1240_v62 = vpop.f32.mrf.mxu0 }
 0x482   : > { %v1869_v1 = vpack.c.bf16 %v1240_v62, %v1240_v62 }
 0x483   : > { %v1965_v2 = vpop.f32.mrf.mxu0 }
 0x484   : > { %1250 = vrot.lane.b32.xlu0 %v1869_v1, %s2358_s17  ;;  %s1865_s17 = sshll.u32 %s2336_s30, 7 }
 0x485   : > { %v1243_v3 = vpop.f32.mrf.mxu0 }
 0x487   : > { %v1966_v4 = vpop.f32.mrf.mxu0 }
 0x488   : > { %v1862_v4 = vld [vmem:[%s2869_s23] ss:$0 sm:$0xff]  ;;  %s2260_s23 = sshll.u32 %s2360_s24, 4  ;;  %s2261_s23 = int_to_ptr.vmem [resolvable:$false] %s2260_s23 }
 0x489   : > { %v1367_v5 = vpop.f32.mrf.mxu0  ;;  %s2262_s30 = scalar_lea.vmem %s2261_s23, 256 }
 0x48a   : > { %v1870_v7 = vpack.c.bf16 %v1367_v5, %v1367_v5 }
 0x48b   : > { %v1977_v8 = vpop.f32.mrf.mxu0 }
 0x48c   : > { %1377 = vrot.lane.b32.xlu1 %v1870_v7, %s2359_s13  ;;  %v1863_v7 = vld [vmem:[%s2870_s22] ss:$0 sm:$0xff]  ;;  %s669_s13 = scalar_lea.vmem [#allocation13], %s1815_s12 }
 0x48d   : > { %v1370_v9 = vpop.f32.mrf.mxu0  ;;  %s1678_s25 = sshll.u32 %s669_s13, 4  ;;  %s1679_s25 = int_to_ptr.vmem [resolvable:$true] %s1678_s25 }
 0x48e   : > { %s2256_s21 = scalar_lea.vmem %s1679_s25, 128  ;;  %p2263_p6 = scmp.lt.s32.totalorder %s1679_s25, %s2261_s23 }
 0x48f   : > { %v1978_v10 = vpop.f32.mrf.mxu0  ;;  %p2257_p2 = scmp.ne.s32.totalorder %s1679_s25, %s2256_s21  ;;  %p2264_p9 = scmp.lt.s32.totalorder %s2262_s30, %s2256_s21 }
 0x491   : > { %p2258_p11 = pnand %p2257_p2, %p2556_p0  ;;  %p2265_p13 = por %p2264_p9, %p2263_p6 }
 0x493   : > { %p2259_p7 = pneg %p2258_p11 }
 0x495   : > { %p2266_p1 = pnand %p2265_p13, %p2259_p7 }
 0x4ee   : > { %v1124_v11 = vpop.permute.xlu1 %1123 }
 0x4ef   : > { %1127 = vst.msk [vmem:[#allocation4] sm:$0xf] %vm1126_vm6, %v1124_v11 }
 0x4f6   : > { %v1251_v12 = vpop.permute.xlu0 %1250 }
 0x4f7   : > { %1254 = vst.msk [vmem:[#allocation4] sm:$0xf] %vm1253_vm7, %v1251_v12 }
 0x4fe   : > { %v1378_v13 = vpop.permute.xlu1 %1377 }
 0x4ff   : > { %1381 = vst.msk [vmem:[#allocation4] sm:$0xf] %vm1380_vm8, %v1378_v13 }
 0x506   : > { %v1382_v14 = vld [vmem:[#allocation4] sm:$0xf] }
 0x507   : > { %1984 = vmatmul.mubr.msk.bf16.vlgmr.msra.gmra.mxu1 %vm706_vm1, %v1382_v14 }
 0x508   : > { %2003 = vmatprep.mubr.msk.bf16.mxu1 %vm2353_vm0, %v2352_v0 }
 0x5c7   : > { %v1443_v16 = vpop.f32.mrf.mxu1 }
 0x5c8   : > { %v1444_v17 = vadd.f32 %v1846_v15, %v1443_v16 }
 0x5c9   : > { %v1985_v18 = vpop.f32.mrf.mxu1 }
 0x5ca   : > { %v1449_v19 = vadd.f32 %v1444_v17, %v2627_v6  ;;  %v2126_v6 = vld [vmem:[%s2816_s14 + $0x18] sm:$0xff]  }
 0x5cb   : > { %v1446_v20 = vpop.f32.mrf.mxu1  ;;  %1996 = vmatpush3.bf16.msra.mxu1 %v2126_v6 }
 0x5cc   : > { %v1452_v21 = vsel %vm706_vm1, %v1449_v19, 0.0  ;;  %1997 = vmatprep.subr.bf16.mxu1 %v2352_v0 }
 0x5cd   : > { %1453 = vadd.xlane.f32.xlu0 %v1452_v21  ;;  %v1986_v22 = vpop.f32.mrf.mxu1 }
 0x5cf   : > { %1998 = vmatpush3.bf16.msra.mxu1 %v2127_v30 }
 0x5d0   : > { %1999 = vmatprep.subr.bf16.mxu1 %v2352_v0 }
 0x5d3   : > { %2000 = vmatpush3.bf16.msra.mxu1 %v2128_v41 }
 0x5d4   : > { %2001 = vmatprep.subr.bf16.mxu1 %v2352_v0  ;;  %v1856_v0 = vld [vmem:[%s2867_s8] ss:$0 sm:$0xff]  ;;  %s1676_s8 = scalar_lea.hbm %s2871_s16, %s1865_s17 }
 0x5d7   : > { %2002 = vmatpush3.bf16.msra.mxu1 %v2129_v42 }
 0x656   : > { %v1454_v23 = vpop.xlane.xlu0 %1453 }
 0x657   : > { %v1456_v24 = vmul.f32 0.03125, %v1454_v23 }
 0x659   : > { %v1457_v25 = vsub.f32 %v1449_v19, %v1456_v24 }
 0x65b   : > { %v1458_v26 = vmul.f32 %v1457_v25, %v1457_v25 }
 0x65d   : > { %v1459_v27 = vsel %vm706_vm1, %v1458_v26, 0.0 }
 0x65e   : > { %1460 = vadd.xlane.f32.xlu1 %v1459_v27 }
 0x6e7   : > { %v1461_v31 = vpop.xlane.xlu1 %1460 }
 0x6e8   : > { %v1462_v32 = vmul.f32 0.03125, %v1461_v31 }
 0x6ea   : > { %v1463_v33 = vadd.f32 1e-05, %v1462_v32 }
 0x6ec   : > { %2146 = vrsqrt.f32 %v1463_v33 }
 0x6f9   : > { %v2147_v34 = vpop.eup %2146 }
 0x6fa   : > { %v1465_v36 = vmul.f32 %v2147_v34, %v1457_v25 }
 0x6fc   : > { %v1472_v38 = vmul.f32 %v1850_v35, %v1465_v36 }
 0x6fe   : > { %v1479_v39 = vadd.f32 %v1851_v37, %v1472_v38 }
 0x700   : > { %v1480_v40 = vpack.c.bf16 %v1479_v39, %v1479_v39 }
 0x702   : > { %1992 = vmatmul.mubr.msk.bf16.vlgmr.msra.gmra.mxu0 %vm706_vm1, %v1480_v40 }
 0x7c2   : > { %v1541_v44 = vpop.f32.mrf.mxu0 }
 0x7c3   : > { %v1542_v45 = vadd.f32 %v1852_v43, %v1541_v44 }
 0x7c4   : > { %v1993_v46 = vpop.f32.mrf.mxu0 }
 0x7c5   : > { %v1547_v47 = vmax.f32 %v1542_v45, 0.0 }
 0x7c6   : > { %v1544_v48 = vpop.f32.mrf.mxu0 }
 0x7c7   : > { %v1548_v49 = vpack.c.bf16 %v1547_v47, %v1547_v47 }
 0x7c8   : > { %v1994_v50 = vpop.f32.mrf.mxu0 }
 0x7c9   : > { %2004 = vmatmul.mubr.msk.bf16.vlgmr.msra.gmra.mxu1 %vm1588_vm9, %v1548_v49 }
 0x889   : > { %v1626_v51 = vpop.f32.mrf.mxu1 }
 0x88a   : > { %v1627_v52 = vadd.f32 %v1856_v0, %v1626_v51 }
 0x88b   : > { %v2005_v53 = vpop.f32.mrf.mxu1 }
 0x88c   : > { %v1632_v54 = vadd.f32 %v1627_v52, %v1479_v39 }
 0x88d   : > { %v1629_v55 = vpop.f32.mrf.mxu1 }
 0x88e   : > { %v1635_v56 = vsel %vm706_vm1, %v1632_v54, 0.0 }
 0x88f   : > { %1636 = vadd.xlane.f32.xlu0 %v1635_v56  ;;  %v2006_v57 = vpop.f32.mrf.mxu1 }
 0x918   : > { %v1637_v58 = vpop.xlane.xlu0 %1636 }
 0x919   : > { %v1638_v59 = vmul.f32 0.03125, %v1637_v58 }
 0x91b   : > { %v1639_v60 = vsub.f32 %v1632_v54, %v1638_v59 }
 0x91d   : > { %v1640_v61 = vmul.f32 %v1639_v60, %v1639_v60 }
 0x91f   : > { %v1641_v62 = vsel %vm706_vm1, %v1640_v61, 0.0 }
 0x920   : > { %1642 = vadd.xlane.f32.xlu0 %v1641_v62 }
 0x9a9   : > { %v1643_v63 = vpop.xlane.xlu0 %1642 }
 0x9aa   : > { %v1644_v1 = vmul.f32 0.03125, %v1643_v63 }
 0x9ac   : > { %v1645_v2 = vadd.f32 1e-05, %v1644_v1 }
 0x9ae   : > { %2148 = vrsqrt.f32 %v1645_v2 }
 0x9bb   : > { %v2149_v3 = vpop.eup %2148 }
 0x9bc   : > { %v1647_v5 = vmul.f32 %v2149_v3, %v1639_v60 }
 0x9be   : > { %v1654_v8 = vmul.f32 %v1862_v4, %v1647_v5 }
 0x9c0   : > { %v1661_v9 = vadd.f32 %v1863_v7, %v1654_v8 }
 0x9c2   : > { %1662 = vst.msk [vmem:[%s669_s13] sm:$0xff] %vm706_vm1, %v1661_v9 }
 0x9c3   : > { %2269 = shalt.err (!%p2266_p1)
}
 0x9c4   : > { %s2270_s12 = scalar_lea.hbm %s1676_s8, 128  ;;  %s2274_s15 = scalar_lea.hbm %s2871_s16, 256 }
 0x9c5   : > { %p2271_p4 = scmp.ne.s32.totalorder %s1676_s8, %s2270_s12  ;;  %p2275_p5 = scmp.lt.s32.totalorder %s1676_s8, %s2871_s16 }
 0x9c6   : > { %p2276_p3 = scmp.lt.s32.totalorder %s2274_s15, %s2270_s12 }
 0x9c7   : > { %p2272_p8 = pnand %p2271_p4, %p2556_p0 }
 0x9c8   : > { %p2277_p10 = por %p2276_p3, %p2275_p5 }
 0x9c9   : > { %p2273_p12 = pneg %p2272_p8 }
 0x9cb   : > { %p2278_p2 = pnand %p2277_p10, %p2273_p12 }
 0x9cd   : > { %2281 = shalt.err (!%p2278_p2)
}
 0x9ce   : > { %2021 = dma.vmem_to_hbm [thread:$0]  (%p2556_p0), %s1679_s25, 128, %s1676_s8, %s1664_s3  }
 0x9cf PF: > { %s2872_s13 = sld [smem:[#allocation18_spill]]  ;;  %p2875_p7 = scmp.ge.s32.totalorder %s2344_s19, 2 }
 0x9d0   : > { %s2873_s27 = sld [smem:[#allocation19_spill]] }
 0x9d5   : > { %s1690_s18 = sand.u32 1, %s2872_s13  }
 0x9d6   : > { %p2874_p11 = scmp.ne.s32.totalorder %s2873_s27, 0  ;;  %s1691_s21 = scalar_lea.sflag [#allocation7], %s1690_s18 }
 0x9d8   : > { %p2038_p6 = pnand %p2875_p7, %p2874_p11 }
 0x9da   : > { %p2039_p9 = pneg %p2038_p6 }
 0x9dc   : > { %2319 = dma.done.wait (%p2039_p9), %s1691_s21, 128  }
 0x9dd   : > { %2321 = vsyncadd (%p2039_p9), %s1691_s21, 4294967168  ;;  %s36_s19 = sadd.s32 1, %s2344_s19   ;;  %s2876_s3 = sld [smem:[#allocation21_spill]] }
 0x9de   : > { %p33_p13 = scmp.ge.s32.totalorder %s36_s19, 4   ;;  %s2877_s27 = smov %s2328_s28 }
 0x9df   : > { %s2878_s28 = smov %s2332_s29  ;;  %s2879_s29 = smov %s2568_s20 }
 0x9e0   : > { %s2880_s30 = smov %s2340_s0  ;;  %35 = sbr.rel (!%p33_p13) target bundleno = 21 (0x15), region = 156 }
 0x9e3   : > { %s2881_s0 = smov %s2876_s3 }
 0x9e5   :  { %1696 = vsyncpa [#allocation6], 1 }
 0x9e6   :  { %1698 = vsyncpa [#allocation6 + $0x1], 1 }
 0x9e7   :  { %1699 = vsyncpa [#allocation9], 1 }
 0x9e8   :  { %1700 = vsyncpa [#allocation12], 1 }
 0x9e9   :  { %1701 = vsyncpa [#allocation7], 1 }
 0x9ea   :  { %1703 = vsyncpa [#allocation7 + $0x1], 1 }

</bundles_post_ra>
